<compile_context>
chip_gen: v7x
topology: tpu7x:2x2x1
jax: 0.10.0
libtpu: 0.0.40
codegen_flags: <defaults>
</compile_context>

<pallas_src>
import functools

import jax
import jax.numpy as jnp
from jax import lax
from jax.experimental import pallas as pl
from jax.experimental.pallas import tpu as pltpu  # noqa: F401  (see TODOs below)


# ----------------------------------------------------------------------------
# Fused Pallas kernel: encoder LSTM -> decoder LSTM -> classifier -> mean CE
# ----------------------------------------------------------------------------
def _seq2seq_kernel(en_ref, de_ref, enc_wih_ref, enc_whh_ref, enc_b_ref,
                    dec_wih_ref, dec_whh_ref, dec_b_ref,
                    cls_w_ref, cls_b_ref, lab_ref, loss_ref,
                    *, T_en, T_de, B):
    H = enc_whh_ref.shape[0]
    Vp = cls_b_ref.shape[1]                  # vocab padded to a multiple of 128
    f32 = jnp.float32
    bf16 = jnp.bfloat16

    # ---- cuDNN-style: all input projections in one batched MXU pass per LSTM
    # ---- (off the serial recurrence chain). Bias (b_ih + b_hh) folded in once.
    enc_xg = (jnp.dot(en_ref[...], enc_wih_ref[...],
                      preferred_element_type=f32) + enc_b_ref[...])   # (T_en*B, 4H)
    dec_xg = (jnp.dot(de_ref[...], dec_wih_ref[...],
                      preferred_element_type=f32) + dec_b_ref[...])   # (T_de*B, 4H)

    enc_whh = enc_whh_ref[...]               # bf16 (H, 4H), loop-invariant hoists
    dec_whh = dec_whh_ref[...]               # bf16 (H, 4H)
    cls_w = cls_w_ref[...]                   # bf16 (H, Vp)
    cls_b = cls_b_ref[...]                   # f32  (1, Vp); padded lanes = -1e30

    def cell(xg, h, c, whh):
        # Recurrent half only: h_{t-1} @ W_hh on the MXU + precomputed x-part.
        gates = xg + jnp.dot(h.astype(bf16), whh, preferred_element_type=f32)  # (B,4H)
        # 2 EUP pushes on the full gate vreg instead of 4 per-gate nonlinearities.
        sg = jax.nn.sigmoid(gates)
        th = jnp.tanh(gates)
        i = sg[:, 0 * H:1 * H]               # PyTorch gate order: i, f, g, o
        f = sg[:, 1 * H:2 * H]
        g = th[:, 2 * H:3 * H]
        o = sg[:, 3 * H:4 * H]
        c_new = f * c + i * g
        h_new = o * jnp.tanh(c_new)          # 3rd (and final) EUP push per step
        return h_new, c_new

    # ---- Encoder: fully unrolled, static slices of the precomputed x-gates.
    # TODO(synk): for production shapes keep H a multiple of 128 and B >= 8 so
    #   gate slices / (B,H) states are full-vreg and the MXU rows are filled.
    h = jnp.zeros((B, H), f32)
    c = jnp.zeros((B, H), f32)
    for t in range(T_en):
        h, c = cell(enc_xg[t * B:(t + 1) * B, :], h, c, enc_whh)

    # ---- Decoder + classifier + mean-CE fused per step (no hidden-state
    # ---- scratch, no masked sub-tile stores, no HBM round trip).
    col = lax.broadcasted_iota(jnp.int32, (B, Vp), 1)
    acc = jnp.zeros((B, 1), f32)
    for t in range(T_de):
        h, c = cell(dec_xg[t * B:(t + 1) * B, :], h, c, dec_whh)
        logits = (jnp.dot(h.astype(bf16), cls_w, preferred_element_type=f32)
                  + cls_b)                                             # (B, Vp)
        m = jnp.max(logits, axis=-1, keepdims=True)                    # 128-lane dense
        lse = m + jnp.log(jnp.sum(jnp.exp(logits - m), axis=-1, keepdims=True))
        lab = lab_ref[t * B:(t + 1) * B, :]                            # (B, 1) int32
        tgt = jnp.sum(jnp.where(col == lab, logits, 0.0),
                      axis=-1, keepdims=True)                          # (B, 1)
        acc = acc + (lse - tgt)

    # Mean over the TRUE token count. Padded columns never contribute: their
    # -1e30 bias loses the max, exp underflows to 0, and iota never matches.
    loss_ref[...] = jnp.sum(acc, axis=0, keepdims=True) * (1.0 / (T_de * B))


def seq2seq_fused(en_x, de_x, enc_wih, enc_whh, enc_b,
                  dec_wih, dec_whh, dec_b, cls_w, cls_b, labels_tm,
                  *, T_en, T_de, B):
    """All operands are tiny and sit whole in VMEM (single-block kernel).

    TODO(synk): at production shapes, tile the classifier/CE over tokens with a
      BlockSpec pipeline, shard the batch over a ("parallel",) grid axis so
      v7x's second TensorCore is used, and set
      pltpu.CompilerParams(vmem_limit_bytes=...) explicitly (v7x has 64 MiB
      VMEM vs 128 MiB on v5e/v6e).
    """
    kernel = functools.partial(_seq2seq_kernel, T_en=T_en, T_de=T_de, B=B)
    return pl.pallas_call(
        kernel,
        out_shape=jax.ShapeDtypeStruct((1, 1), jnp.float32),
    )(en_x, de_x, enc_wih, enc_whh, enc_b, dec_wih, dec_whh, dec_b,
      cls_w, cls_b, labels_tm)


# ----------------------------------------------------------------------------
# Seq2Seq forward (glue: embedding gathers, transposes, padding, casts in XLA)
# ----------------------------------------------------------------------------
def seq2seq_loss(params, en_index, ch_index):
    decoder_input = ch_index[:, :-1]
    label = ch_index[:, 1:]
    B, T_en = en_index.shape
    T_de = decoder_input.shape[1]
    V = params["cls_w"].shape[1]

    # Embedding lookups (XLA glue), time-major flatten (row = t*B + b),
    # bf16 MXU operands.
    en_emb = jnp.take(params["enc_emb"], en_index, axis=0)           # (B, T_en, E)
    en_x = jnp.transpose(en_emb, (1, 0, 2)).reshape(T_en * B, -1).astype(jnp.bfloat16)
    de_emb = jnp.take(params["dec_emb"], decoder_input, axis=0)      # (B, T_de, E)
    de_x = jnp.transpose(de_emb, (1, 0, 2)).reshape(T_de * B, -1).astype(jnp.bfloat16)

    # Pad vocab up to a multiple of 128 lanes; pad bias = -1e30 so padded logits
    # never win the max, contribute ~0 to the exp-sum, and never match a label.
    Vp = max(128, ((V + 127) // 128) * 128)
    cls_w_p = jnp.pad(params["cls_w"], ((0, 0), (0, Vp - V))).astype(jnp.bfloat16)
    cls_b_p = jnp.pad(params["cls_b"], ((0, 0), (0, Vp - V)),
                      constant_values=-1e30).astype(jnp.float32)

    # Labels flattened time-major (mean CE is token-permutation-invariant, so
    # this matches PyTorch's batch-major flatten).
    labels_tm = jnp.transpose(label, (1, 0)).reshape(-1, 1).astype(jnp.int32)

    loss = seq2seq_fused(
        en_x, de_x,
        params["enc_wih"].astype(jnp.bfloat16),
        params["enc_whh"].astype(jnp.bfloat16),
        params["enc_b"].astype(jnp.float32),
        params["dec_wih"].astype(jnp.bfloat16),
        params["dec_whh"].astype(jnp.bfloat16),
        params["dec_b"].astype(jnp.float32),
        cls_w_p, cls_b_p, labels_tm,
        T_en=T_en, T_de=T_de, B=B)
    return loss[0, 0]


# ----------------------------------------------------------------------------
# Pure-JAX float32 reference (for correctness check)
# ----------------------------------------------------------------------------
def _lstm_ref(x_tbe, h0, c0, w_ih, w_hh, b):
    H = h0.shape[-1]

    def step(carry, x):
        h, c = carry
        gates = x @ w_ih + h @ w_hh + b[0]
        i = jax.nn.sigmoid(gates[:, 0:H])
        f = jax.nn.sigmoid(gates[:, H:2 * H])
        g = jnp.tanh(gates[:, 2 * H:3 * H])
        o = jax.nn.sigmoid(gates[:, 3 * H:4 * H])
        c = f * c + i * g
        h = o * jnp.tanh(c)
        return (h, c), h

    (hT, cT), hs = jax.lax.scan(step, (h0, c0), x_tbe)
    return hs, hT, cT


def seq2seq_loss_ref(params, en_index, ch_index):
    decoder_input = ch_index[:, :-1]
    label = ch_index[:, 1:]
    B = en_index.shape[0]
    H = params["enc_whh"].shape[0]
    en_emb = jnp.transpose(jnp.take(params["enc_emb"], en_index, axis=0), (1, 0, 2))
    zeros = jnp.zeros((B, H), jnp.float32)
    _, h_T, c_T = _lstm_ref(en_emb, zeros, zeros,
                            params["enc_wih"], params["enc_whh"], params["enc_b"])
    de_emb = jnp.transpose(jnp.take(params["dec_emb"], decoder_input, axis=0), (1, 0, 2))
    dec_hs, _, _ = _lstm_ref(de_emb, h_T, c_T,
                             params["dec_wih"], params["dec_whh"], params["dec_b"])
    dec_hs = jnp.transpose(dec_hs, (1, 0, 2)).reshape(-1, H)
    logits = dec_hs @ params["cls_w"] + params["cls_b"][0]
    labels_flat = label.reshape(-1)
    logz = jax.scipy.special.logsumexp(logits, axis=-1)
    tgt = jnp.take_along_axis(logits, labels_flat[:, None], axis=-1)[:, 0]
    return jnp.mean(logz - tgt)


# ----------------------------------------------------------------------------
# Deterministic parameter init (module __init__ gives the shapes)
# ----------------------------------------------------------------------------
def init_params(key, enc_emb_num, enc_hid, en_len, dec_emb_num, dec_hid, ch_len):
    ks = jax.random.split(key, 12)
    s = 0.1
    p = {}
    p["enc_emb"] = jax.random.normal(ks[0], (en_len, enc_emb_num), jnp.float32) * s
    p["enc_wih"] = jax.random.normal(ks[1], (enc_emb_num, 4 * enc_hid), jnp.float32) * s
    p["enc_whh"] = jax.random.normal(ks[2], (enc_hid, 4 * enc_hid), jnp.float32) * s
    p["enc_b"] = (jax.random.normal(ks[3], (1, 4 * enc_hid), jnp.float32) * s
                  + jax.random.normal(ks[4], (1, 4 * enc_hid), jnp.float32) * s)
    p["dec_emb"] = jax.random.normal(ks[5], (ch_len, dec_emb_num), jnp.float32) * s
    p["dec_wih"] = jax.random.normal(ks[6], (dec_emb_num, 4 * dec_hid), jnp.float32) * s
    p["dec_whh"] = jax.random.normal(ks[7], (dec_hid, 4 * dec_hid), jnp.float32) * s
    p["dec_b"] = (jax.random.normal(ks[8], (1, 4 * dec_hid), jnp.float32) * s
                  + jax.random.normal(ks[9], (1, 4 * dec_hid), jnp.float32) * s)
    p["cls_w"] = jax.random.normal(ks[10], (dec_hid, ch_len), jnp.float32) * s
    p["cls_b"] = jax.random.normal(ks[11], (1, ch_len), jnp.float32) * s
    return p


if __name__ == "__main__":
    # Small shapes consistent with the module's forward.
    B = 2
    T_EN = 8          # english sequence length
    T_CH = 9          # chinese sequence length (decoder uses T_CH - 1 = 8)
    ENC_EMB = 32
    ENC_HID = 32      # decoder hidden must equal encoder hidden (shared state)
    DEC_EMB = 32
    DEC_HID = 32
    EN_LEN = 50       # en_corpus_len
    CH_LEN = 40       # ch_corpus_len

    key = jax.random.PRNGKey(0)
    k_par, k_en, k_ch = jax.random.split(key, 3)

    params = init_params(k_par, ENC_EMB, ENC_HID, EN_LEN, DEC_EMB, DEC_HID, CH_LEN)
    en_index = jax.random.randint(k_en, (B, T_EN), 0, EN_LEN, dtype=jnp.int32)
    ch_index = jax.random.randint(k_ch, (B, T_CH), 0, CH_LEN, dtype=jnp.int32)

    loss = jax.jit(seq2seq_loss)(params, en_index, ch_index)
    loss = jax.block_until_ready(loss)

    loss_ref = jax.block_until_ready(seq2seq_loss_ref(params, en_index, ch_index))
    # Tolerance loosened vs. 1e-4 because MXU operands are bfloat16 (f32 accum);
    # observed error is O(1e-3) on a loss of ~log(V).
    assert jnp.allclose(loss, loss_ref, atol=2e-2, rtol=2e-2), (loss, loss_ref)

    print("KERNEL_OK")
</pallas_src>

<mosaic_0001>
module attributes {stable_mosaic.version = 11 : i64} {
  func.func @_seq2seq_kernel(%arg0: memref<16x32xbf16, #tpu.memory_space<vmem>>, %arg1: memref<16x32xbf16, #tpu.memory_space<vmem>>, %arg2: memref<32x128xbf16, #tpu.memory_space<vmem>>, %arg3: memref<32x128xbf16, #tpu.memory_space<vmem>>, %arg4: memref<1x128xf32, #tpu.memory_space<vmem>>, %arg5: memref<32x128xbf16, #tpu.memory_space<vmem>>, %arg6: memref<32x128xbf16, #tpu.memory_space<vmem>>, %arg7: memref<1x128xf32, #tpu.memory_space<vmem>>, %arg8: memref<32x128xbf16, #tpu.memory_space<vmem>>, %arg9: memref<1x128xf32, #tpu.memory_space<vmem>>, %arg10: memref<16x1xi32, #tpu.memory_space<vmem>>, %arg11: memref<1x1xf32, #tpu.memory_space<vmem>>) attributes {dimension_semantics = [], scalar_prefetch = 0 : i64, scratch_operands = 0 : i64, tpu.core_type = #tpu.core_type<tc>} {
    %c0 = arith.constant 0 : index
    %c0_0 = arith.constant 0 : index
    %0 = vector.load %arg0[%c0, %c0_0] : memref<16x32xbf16, #tpu.memory_space<vmem>>, vector<16x32xbf16>
    %c0_1 = arith.constant 0 : index
    %c0_2 = arith.constant 0 : index
    %1 = vector.load %arg2[%c0_1, %c0_2] : memref<32x128xbf16, #tpu.memory_space<vmem>>, vector<32x128xbf16>
    %cst = arith.constant dense<0.000000e+00> : vector<16x128xf32>
    %2 = tpu.matmul %0, %1, %cst {dimension_numbers = #tpu.dot_dimension_numbers<[1], [0], [0], [1], [0, 0, 1, 1], [], []>} : vector<16x32xbf16>, vector<32x128xbf16>, vector<16x128xf32> -> vector<16x128xf32>
    %c0_3 = arith.constant 0 : index
    %c0_4 = arith.constant 0 : index
    %3 = vector.load %arg4[%c0_3, %c0_4] : memref<1x128xf32, #tpu.memory_space<vmem>>, vector<1x128xf32>
    %4 = vector.broadcast %3 : vector<1x128xf32> to vector<16x128xf32>
    %5 = arith.addf %2, %4 : vector<16x128xf32>
    %c0_5 = arith.constant 0 : index
    %c0_6 = arith.constant 0 : index
    %6 = vector.load %arg1[%c0_5, %c0_6] : memref<16x32xbf16, #tpu.memory_space<vmem>>, vector<16x32xbf16>
    %c0_7 = arith.constant 0 : index
    %c0_8 = arith.constant 0 : index
    %7 = vector.load %arg5[%c0_7, %c0_8] : memref<32x128xbf16, #tpu.memory_space<vmem>>, vector<32x128xbf16>
    %cst_9 = arith.constant dense<0.000000e+00> : vector<16x128xf32>
    %8 = tpu.matmul %6, %7, %cst_9 {dimension_numbers = #tpu.dot_dimension_numbers<[1], [0], [0], [1], [0, 0, 1, 1], [], []>} : vector<16x32xbf16>, vector<32x128xbf16>, vector<16x128xf32> -> vector<16x128xf32>
    %c0_10 = arith.constant 0 : index
    %c0_11 = arith.constant 0 : index
    %9 = vector.load %arg7[%c0_10, %c0_11] : memref<1x128xf32, #tpu.memory_space<vmem>>, vector<1x128xf32>
    %10 = vector.broadcast %9 : vector<1x128xf32> to vector<16x128xf32>
    %11 = arith.addf %8, %10 : vector<16x128xf32>
    %c0_12 = arith.constant 0 : index
    %c0_13 = arith.constant 0 : index
    %12 = vector.load %arg3[%c0_12, %c0_13] : memref<32x128xbf16, #tpu.memory_space<vmem>>, vector<32x128xbf16>
    %c0_14 = arith.constant 0 : index
    %c0_15 = arith.constant 0 : index
    %13 = vector.load %arg6[%c0_14, %c0_15] : memref<32x128xbf16, #tpu.memory_space<vmem>>, vector<32x128xbf16>
    %c0_16 = arith.constant 0 : index
    %c0_17 = arith.constant 0 : index
    %14 = vector.load %arg8[%c0_16, %c0_17] : memref<32x128xbf16, #tpu.memory_space<vmem>>, vector<32x128xbf16>
    %c0_18 = arith.constant 0 : index
    %c0_19 = arith.constant 0 : index
    %15 = vector.load %arg9[%c0_18, %c0_19] : memref<1x128xf32, #tpu.memory_space<vmem>>, vector<1x128xf32>
    %cst_20 = arith.constant 0.000000e+00 : f32
    %16 = vector.broadcast %cst_20 : f32 to vector<2x32xf32>
    %cst_21 = arith.constant 0.000000e+00 : f32
    %17 = vector.broadcast %cst_21 : f32 to vector<2x32xf32>
    %18 = vector.extract_strided_slice %5 {offsets = [0, 0], sizes = [2, 128], strides = [1, 1]} : vector<16x128xf32> to vector<2x128xf32>
    %19 = arith.truncf %16 : vector<2x32xf32> to vector<2x32xbf16>
    %cst_22 = arith.constant dense<0.000000e+00> : vector<2x128xf32>
    %20 = tpu.matmul %19, %12, %cst_22 {dimension_numbers = #tpu.dot_dimension_numbers<[1], [0], [0], [1], [0, 0, 1, 1], [], []>} : vector<2x32xbf16>, vector<32x128xbf16>, vector<2x128xf32> -> vector<2x128xf32>
    %21 = arith.addf %18, %20 : vector<2x128xf32>
    %22 = arith.negf %21 : vector<2x128xf32>
    %23 = math.exp %22 : vector<2x128xf32>
    %cst_23 = arith.constant 1.000000e+00 : f32
    %24 = vector.broadcast %cst_23 : f32 to vector<2x128xf32>
    %25 = arith.addf %24, %23 : vector<2x128xf32>
    %26 = arith.divf %24, %25 : vector<2x128xf32>
    %27 = math.tanh %21 : vector<2x128xf32>
    %28 = vector.extract_strided_slice %26 {offsets = [0, 0], sizes = [2, 32], strides = [1, 1]} : vector<2x128xf32> to vector<2x32xf32>
    %29 = vector.extract_strided_slice %26 {offsets = [0, 32], sizes = [2, 32], strides = [1, 1]} : vector<2x128xf32> to vector<2x32xf32>
    %30 = vector.extract_strided_slice %27 {offsets = [0, 64], sizes = [2, 32], strides = [1, 1]} : vector<2x128xf32> to vector<2x32xf32>
    %31 = vector.extract_strided_slice %26 {offsets = [0, 96], sizes = [2, 32], strides = [1, 1]} : vector<2x128xf32> to vector<2x32xf32>
    %32 = arith.mulf %29, %17 : vector<2x32xf32>
    %33 = arith.mulf %28, %30 : vector<2x32xf32>
    %34 = arith.addf %32, %33 : vector<2x32xf32>
    %35 = math.tanh %34 : vector<2x32xf32>
    %36 = arith.mulf %31, %35 : vector<2x32xf32>
    %37 = vector.extract_strided_slice %5 {offsets = [2, 0], sizes = [2, 128], strides = [1, 1]} : vector<16x128xf32> to vector<2x128xf32>
    %38 = arith.truncf %36 : vector<2x32xf32> to vector<2x32xbf16>
    %cst_24 = arith.constant dense<0.000000e+00> : vector<2x128xf32>
    %39 = tpu.matmul %38, %12, %cst_24 {dimension_numbers = #tpu.dot_dimension_numbers<[1], [0], [0], [1], [0, 0, 1, 1], [], []>} : vector<2x32xbf16>, vector<32x128xbf16>, vector<2x128xf32> -> vector<2x128xf32>
    %40 = arith.addf %37, %39 : vector<2x128xf32>
    %41 = arith.negf %40 : vector<2x128xf32>
    %42 = math.exp %41 : vector<2x128xf32>
    %cst_25 = arith.constant 1.000000e+00 : f32
    %43 = vector.broadcast %cst_25 : f32 to vector<2x128xf32>
    %44 = arith.addf %43, %42 : vector<2x128xf32>
    %45 = arith.divf %43, %44 : vector<2x128xf32>
    %46 = math.tanh %40 : vector<2x128xf32>
    %47 = vector.extract_strided_slice %45 {offsets = [0, 0], sizes = [2, 32], strides = [1, 1]} : vector<2x128xf32> to vector<2x32xf32>
    %48 = vector.extract_strided_slice %45 {offsets = [0, 32], sizes = [2, 32], strides = [1, 1]} : vector<2x128xf32> to vector<2x32xf32>
    %49 = vector.extract_strided_slice %46 {offsets = [0, 64], sizes = [2, 32], strides = [1, 1]} : vector<2x128xf32> to vector<2x32xf32>
    %50 = vector.extract_strided_slice %45 {offsets = [0, 96], sizes = [2, 32], strides = [1, 1]} : vector<2x128xf32> to vector<2x32xf32>
    %51 = arith.mulf %48, %34 : vector<2x32xf32>
    %52 = arith.mulf %47, %49 : vector<2x32xf32>
    %53 = arith.addf %51, %52 : vector<2x32xf32>
    %54 = math.tanh %53 : vector<2x32xf32>
    %55 = arith.mulf %50, %54 : vector<2x32xf32>
    %56 = vector.extract_strided_slice %5 {offsets = [4, 0], sizes = [2, 128], strides = [1, 1]} : vector<16x128xf32> to vector<2x128xf32>
    %57 = arith.truncf %55 : vector<2x32xf32> to vector<2x32xbf16>
    %cst_26 = arith.constant dense<0.000000e+00> : vector<2x128xf32>
    %58 = tpu.matmul %57, %12, %cst_26 {dimension_numbers = #tpu.dot_dimension_numbers<[1], [0], [0], [1], [0, 0, 1, 1], [], []>} : vector<2x32xbf16>, vector<32x128xbf16>, vector<2x128xf32> -> vector<2x128xf32>
    %59 = arith.addf %56, %58 : vector<2x128xf32>
    %60 = arith.negf %59 : vector<2x128xf32>
    %61 = math.exp %60 : vector<2x128xf32>
    %cst_27 = arith.constant 1.000000e+00 : f32
    %62 = vector.broadcast %cst_27 : f32 to vector<2x128xf32>
    %63 = arith.addf %62, %61 : vector<2x128xf32>
    %64 = arith.divf %62, %63 : vector<2x128xf32>
    %65 = math.tanh %59 : vector<2x128xf32>
    %66 = vector.extract_strided_slice %64 {offsets = [0, 0], sizes = [2, 32], strides = [1, 1]} : vector<2x128xf32> to vector<2x32xf32>
    %67 = vector.extract_strided_slice %64 {offsets = [0, 32], sizes = [2, 32], strides = [1, 1]} : vector<2x128xf32> to vector<2x32xf32>
    %68 = vector.extract_strided_slice %65 {offsets = [0, 64], sizes = [2, 32], strides = [1, 1]} : vector<2x128xf32> to vector<2x32xf32>
    %69 = vector.extract_strided_slice %64 {offsets = [0, 96], sizes = [2, 32], strides = [1, 1]} : vector<2x128xf32> to vector<2x32xf32>
    %70 = arith.mulf %67, %53 : vector<2x32xf32>
    %71 = arith.mulf %66, %68 : vector<2x32xf32>
    %72 = arith.addf %70, %71 : vector<2x32xf32>
    %73 = math.tanh %72 : vector<2x32xf32>
    %74 = arith.mulf %69, %73 : vector<2x32xf32>
    %75 = vector.extract_strided_slice %5 {offsets = [6, 0], sizes = [2, 128], strides = [1, 1]} : vector<16x128xf32> to vector<2x128xf32>
    %76 = arith.truncf %74 : vector<2x32xf32> to vector<2x32xbf16>
    %cst_28 = arith.constant dense<0.000000e+00> : vector<2x128xf32>
    %77 = tpu.matmul %76, %12, %cst_28 {dimension_numbers = #tpu.dot_dimension_numbers<[1], [0], [0], [1], [0, 0, 1, 1], [], []>} : vector<2x32xbf16>, vector<32x128xbf16>, vector<2x128xf32> -> vector<2x128xf32>
    %78 = arith.addf %75, %77 : vector<2x128xf32>
    %79 = arith.negf %78 : vector<2x128xf32>
    %80 = math.exp %79 : vector<2x128xf32>
    %cst_29 = arith.constant 1.000000e+00 : f32
    %81 = vector.broadcast %cst_29 : f32 to vector<2x128xf32>
    %82 = arith.addf %81, %80 : vector<2x128xf32>
    %83 = arith.divf %81, %82 : vector<2x128xf32>
    %84 = math.tanh %78 : vector<2x128xf32>
    %85 = vector.extract_strided_slice %83 {offsets = [0, 0], sizes = [2, 32], strides = [1, 1]} : vector<2x128xf32> to vector<2x32xf32>
    %86 = vector.extract_strided_slice %83 {offsets = [0, 32], sizes = [2, 32], strides = [1, 1]} : vector<2x128xf32> to vector<2x32xf32>
    %87 = vector.extract_strided_slice %84 {offsets = [0, 64], sizes = [2, 32], strides = [1, 1]} : vector<2x128xf32> to vector<2x32xf32>
    %88 = vector.extract_strided_slice %83 {offsets = [0, 96], sizes = [2, 32], strides = [1, 1]} : vector<2x128xf32> to vector<2x32xf32>
    %89 = arith.mulf %86, %72 : vector<2x32xf32>
    %90 = arith.mulf %85, %87 : vector<2x32xf32>
    %91 = arith.addf %89, %90 : vector<2x32xf32>
    %92 = math.tanh %91 : vector<2x32xf32>
    %93 = arith.mulf %88, %92 : vector<2x32xf32>
    %94 = vector.extract_strided_slice %5 {offsets = [8, 0], sizes = [2, 128], strides = [1, 1]} : vector<16x128xf32> to vector<2x128xf32>
    %95 = arith.truncf %93 : vector<2x32xf32> to vector<2x32xbf16>
    %cst_30 = arith.constant dense<0.000000e+00> : vector<2x128xf32>
    %96 = tpu.matmul %95, %12, %cst_30 {dimension_numbers = #tpu.dot_dimension_numbers<[1], [0], [0], [1], [0, 0, 1, 1], [], []>} : vector<2x32xbf16>, vector<32x128xbf16>, vector<2x128xf32> -> vector<2x128xf32>
    %97 = arith.addf %94, %96 : vector<2x128xf32>
    %98 = arith.negf %97 : vector<2x128xf32>
    %99 = math.exp %98 : vector<2x128xf32>
    %cst_31 = arith.constant 1.000000e+00 : f32
    %100 = vector.broadcast %cst_31 : f32 to vector<2x128xf32>
    %101 = arith.addf %100, %99 : vector<2x128xf32>
    %102 = arith.divf %100, %101 : vector<2x128xf32>
    %103 = math.tanh %97 : vector<2x128xf32>
    %104 = vector.extract_strided_slice %102 {offsets = [0, 0], sizes = [2, 32], strides = [1, 1]} : vector<2x128xf32> to vector<2x32xf32>
    %105 = vector.extract_strided_slice %102 {offsets = [0, 32], sizes = [2, 32], strides = [1, 1]} : vector<2x128xf32> to vector<2x32xf32>
    %106 = vector.extract_strided_slice %103 {offsets = [0, 64], sizes = [2, 32], strides = [1, 1]} : vector<2x128xf32> to vector<2x32xf32>
    %107 = vector.extract_strided_slice %102 {offsets = [0, 96], sizes = [2, 32], strides = [1, 1]} : vector<2x128xf32> to vector<2x32xf32>
    %108 = arith.mulf %105, %91 : vector<2x32xf32>
    %109 = arith.mulf %104, %106 : vector<2x32xf32>
    %110 = arith.addf %108, %109 : vector<2x32xf32>
    %111 = math.tanh %110 : vector<2x32xf32>
    %112 = arith.mulf %107, %111 : vector<2x32xf32>
    %113 = vector.extract_strided_slice %5 {offsets = [10, 0], sizes = [2, 128], strides = [1, 1]} : vector<16x128xf32> to vector<2x128xf32>
    %114 = arith.truncf %112 : vector<2x32xf32> to vector<2x32xbf16>
    %cst_32 = arith.constant dense<0.000000e+00> : vector<2x128xf32>
    %115 = tpu.matmul %114, %12, %cst_32 {dimension_numbers = #tpu.dot_dimension_numbers<[1], [0], [0], [1], [0, 0, 1, 1], [], []>} : vector<2x32xbf16>, vector<32x128xbf16>, vector<2x128xf32> -> vector<2x128xf32>
    %116 = arith.addf %113, %115 : vector<2x128xf32>
    %117 = arith.negf %116 : vector<2x128xf32>
    %118 = math.exp %117 : vector<2x128xf32>
    %cst_33 = arith.constant 1.000000e+00 : f32
    %119 = vector.broadcast %cst_33 : f32 to vector<2x128xf32>
    %120 = arith.addf %119, %118 : vector<2x128xf32>
    %121 = arith.divf %119, %120 : vector<2x128xf32>
    %122 = math.tanh %116 : vector<2x128xf32>
    %123 = vector.extract_strided_slice %121 {offsets = [0, 0], sizes = [2, 32], strides = [1, 1]} : vector<2x128xf32> to vector<2x32xf32>
    %124 = vector.extract_strided_slice %121 {offsets = [0, 32], sizes = [2, 32], strides = [1, 1]} : vector<2x128xf32> to vector<2x32xf32>
    %125 = vector.extract_strided_slice %122 {offsets = [0, 64], sizes = [2, 32], strides = [1, 1]} : vector<2x128xf32> to vector<2x32xf32>
    %126 = vector.extract_strided_slice %121 {offsets = [0, 96], sizes = [2, 32], strides = [1, 1]} : vector<2x128xf32> to vector<2x32xf32>
    %127 = arith.mulf %124, %110 : vector<2x32xf32>
    %128 = arith.mulf %123, %125 : vector<2x32xf32>
    %129 = arith.addf %127, %128 : vector<2x32xf32>
    %130 = math.tanh %129 : vector<2x32xf32>
    %131 = arith.mulf %126, %130 : vector<2x32xf32>
    %132 = vector.extract_strided_slice %5 {offsets = [12, 0], sizes = [2, 128], strides = [1, 1]} : vector<16x128xf32> to vector<2x128xf32>
    %133 = arith.truncf %131 : vector<2x32xf32> to vector<2x32xbf16>
    %cst_34 = arith.constant dense<0.000000e+00> : vector<2x128xf32>
    %134 = tpu.matmul %133, %12, %cst_34 {dimension_numbers = #tpu.dot_dimension_numbers<[1], [0], [0], [1], [0, 0, 1, 1], [], []>} : vector<2x32xbf16>, vector<32x128xbf16>, vector<2x128xf32> -> vector<2x128xf32>
    %135 = arith.addf %132, %134 : vector<2x128xf32>
    %136 = arith.negf %135 : vector<2x128xf32>
    %137 = math.exp %136 : vector<2x128xf32>
    %cst_35 = arith.constant 1.000000e+00 : f32
    %138 = vector.broadcast %cst_35 : f32 to vector<2x128xf32>
    %139 = arith.addf %138, %137 : vector<2x128xf32>
    %140 = arith.divf %138, %139 : vector<2x128xf32>
    %141 = math.tanh %135 : vector<2x128xf32>
    %142 = vector.extract_strided_slice %140 {offsets = [0, 0], sizes = [2, 32], strides = [1, 1]} : vector<2x128xf32> to vector<2x32xf32>
    %143 = vector.extract_strided_slice %140 {offsets = [0, 32], sizes = [2, 32], strides = [1, 1]} : vector<2x128xf32> to vector<2x32xf32>
    %144 = vector.extract_strided_slice %141 {offsets = [0, 64], sizes = [2, 32], strides = [1, 1]} : vector<2x128xf32> to vector<2x32xf32>
    %145 = vector.extract_strided_slice %140 {offsets = [0, 96], sizes = [2, 32], strides = [1, 1]} : vector<2x128xf32> to vector<2x32xf32>
    %146 = arith.mulf %143, %129 : vector<2x32xf32>
    %147 = arith.mulf %142, %144 : vector<2x32xf32>
    %148 = arith.addf %146, %147 : vector<2x32xf32>
    %149 = math.tanh %148 : vector<2x32xf32>
    %150 = arith.mulf %145, %149 : vector<2x32xf32>
    %151 = vector.extract_strided_slice %5 {offsets = [14, 0], sizes = [2, 128], strides = [1, 1]} : vector<16x128xf32> to vector<2x128xf32>
    %152 = arith.truncf %150 : vector<2x32xf32> to vector<2x32xbf16>
    %cst_36 = arith.constant dense<0.000000e+00> : vector<2x128xf32>
    %153 = tpu.matmul %152, %12, %cst_36 {dimension_numbers = #tpu.dot_dimension_numbers<[1], [0], [0], [1], [0, 0, 1, 1], [], []>} : vector<2x32xbf16>, vector<32x128xbf16>, vector<2x128xf32> -> vector<2x128xf32>
    %154 = arith.addf %151, %153 : vector<2x128xf32>
    %155 = arith.negf %154 : vector<2x128xf32>
    %156 = math.exp %155 : vector<2x128xf32>
    %cst_37 = arith.constant 1.000000e+00 : f32
    %157 = vector.broadcast %cst_37 : f32 to vector<2x128xf32>
    %158 = arith.addf %157, %156 : vector<2x128xf32>
    %159 = arith.divf %157, %158 : vector<2x128xf32>
    %160 = math.tanh %154 : vector<2x128xf32>
    %161 = vector.extract_strided_slice %159 {offsets = [0, 0], sizes = [2, 32], strides = [1, 1]} : vector<2x128xf32> to vector<2x32xf32>
    %162 = vector.extract_strided_slice %159 {offsets = [0, 32], sizes = [2, 32], strides = [1, 1]} : vector<2x128xf32> to vector<2x32xf32>
    %163 = vector.extract_strided_slice %160 {offsets = [0, 64], sizes = [2, 32], strides = [1, 1]} : vector<2x128xf32> to vector<2x32xf32>
    %164 = vector.extract_strided_slice %159 {offsets = [0, 96], sizes = [2, 32], strides = [1, 1]} : vector<2x128xf32> to vector<2x32xf32>
    %165 = arith.mulf %162, %148 : vector<2x32xf32>
    %166 = arith.mulf %161, %163 : vector<2x32xf32>
    %167 = arith.addf %165, %166 : vector<2x32xf32>
    %168 = math.tanh %167 : vector<2x32xf32>
    %169 = arith.mulf %164, %168 : vector<2x32xf32>
    %170 = tpu.iota {dimensions = array<i32: 1>} : vector<2x128xi32>
    %cst_38 = arith.constant 0.000000e+00 : f32
    %171 = vector.broadcast %cst_38 : f32 to vector<2x1xf32>
    %172 = vector.extract_strided_slice %11 {offsets = [0, 0], sizes = [2, 128], strides = [1, 1]} : vector<16x128xf32> to vector<2x128xf32>
    %173 = arith.truncf %169 : vector<2x32xf32> to vector<2x32xbf16>
    %cst_39 = arith.constant dense<0.000000e+00> : vector<2x128xf32>
    %174 = tpu.matmul %173, %13, %cst_39 {dimension_numbers = #tpu.dot_dimension_numbers<[1], [0], [0], [1], [0, 0, 1, 1], [], []>} : vector<2x32xbf16>, vector<32x128xbf16>, vector<2x128xf32> -> vector<2x128xf32>
    %175 = arith.addf %172, %174 : vector<2x128xf32>
    %176 = arith.negf %175 : vector<2x128xf32>
    %177 = math.exp %176 : vector<2x128xf32>
    %cst_40 = arith.constant 1.000000e+00 : f32
    %178 = vector.broadcast %cst_40 : f32 to vector<2x128xf32>
    %179 = arith.addf %178, %177 : vector<2x128xf32>
    %180 = arith.divf %178, %179 : vector<2x128xf32>
    %181 = math.tanh %175 : vector<2x128xf32>
    %182 = vector.extract_strided_slice %180 {offsets = [0, 0], sizes = [2, 32], strides = [1, 1]} : vector<2x128xf32> to vector<2x32xf32>
    %183 = vector.extract_strided_slice %180 {offsets = [0, 32], sizes = [2, 32], strides = [1, 1]} : vector<2x128xf32> to vector<2x32xf32>
    %184 = vector.extract_strided_slice %181 {offsets = [0, 64], sizes = [2, 32], strides = [1, 1]} : vector<2x128xf32> to vector<2x32xf32>
    %185 = vector.extract_strided_slice %180 {offsets = [0, 96], sizes = [2, 32], strides = [1, 1]} : vector<2x128xf32> to vector<2x32xf32>
    %186 = arith.mulf %183, %167 : vector<2x32xf32>
    %187 = arith.mulf %182, %184 : vector<2x32xf32>
    %188 = arith.addf %186, %187 : vector<2x32xf32>
    %189 = math.tanh %188 : vector<2x32xf32>
    %190 = arith.mulf %185, %189 : vector<2x32xf32>
    %191 = arith.truncf %190 : vector<2x32xf32> to vector<2x32xbf16>
    %cst_41 = arith.constant dense<0.000000e+00> : vector<2x128xf32>
    %192 = tpu.matmul %191, %14, %cst_41 {dimension_numbers = #tpu.dot_dimension_numbers<[1], [0], [0], [1], [0, 0, 1, 1], [], []>} : vector<2x32xbf16>, vector<32x128xbf16>, vector<2x128xf32> -> vector<2x128xf32>
    %193 = vector.broadcast %15 : vector<1x128xf32> to vector<2x128xf32>
    %194 = arith.addf %192, %193 : vector<2x128xf32>
    %cst_42 = arith.constant dense<0xFF800000> : vector<2xf32>
    %195 = vector.multi_reduction <maximumf>, %194, %cst_42 [1] : vector<2x128xf32> to vector<2xf32>
    %196 = vector.shape_cast %195 : vector<2xf32> to vector<2x1xf32>
    %197 = vector.broadcast %196 : vector<2x1xf32> to vector<2x128xf32>
    %198 = arith.subf %194, %197 : vector<2x128xf32>
    %199 = math.exp %198 : vector<2x128xf32>
    %cst_43 = arith.constant dense<0.000000e+00> : vector<2xf32>
    %200 = vector.multi_reduction <add>, %199, %cst_43 [1] : vector<2x128xf32> to vector<2xf32>
    %201 = vector.shape_cast %200 : vector<2xf32> to vector<2x1xf32>
    %202 = math.log %201 : vector<2x1xf32>
    %203 = arith.addf %196, %202 : vector<2x1xf32>
    %c0_44 = arith.constant 0 : index
    %c0_45 = arith.constant 0 : index
    %204 = vector.load %arg10[%c0_44, %c0_45] : memref<16x1xi32, #tpu.memory_space<vmem>>, vector<2x1xi32>
    %205 = vector.broadcast %204 : vector<2x1xi32> to vector<2x128xi32>
    %206 = arith.cmpi eq, %170, %205 : vector<2x128xi32>
    %cst_46 = arith.constant 0.000000e+00 : f32
    %207 = vector.broadcast %cst_46 : f32 to vector<2x128xf32>
    %208 = arith.select %206, %194, %207 : vector<2x128xi1>, vector<2x128xf32>
    %cst_47 = arith.constant dense<0.000000e+00> : vector<2xf32>
    %209 = vector.multi_reduction <add>, %208, %cst_47 [1] : vector<2x128xf32> to vector<2xf32>
    %210 = vector.shape_cast %209 : vector<2xf32> to vector<2x1xf32>
    %211 = arith.subf %203, %210 : vector<2x1xf32>
    %212 = arith.addf %171, %211 : vector<2x1xf32>
    %213 = vector.extract_strided_slice %11 {offsets = [2, 0], sizes = [2, 128], strides = [1, 1]} : vector<16x128xf32> to vector<2x128xf32>
    %214 = arith.truncf %190 : vector<2x32xf32> to vector<2x32xbf16>
    %cst_48 = arith.constant dense<0.000000e+00> : vector<2x128xf32>
    %215 = tpu.matmul %214, %13, %cst_48 {dimension_numbers = #tpu.dot_dimension_numbers<[1], [0], [0], [1], [0, 0, 1, 1], [], []>} : vector<2x32xbf16>, vector<32x128xbf16>, vector<2x128xf32> -> vector<2x128xf32>
    %216 = arith.addf %213, %215 : vector<2x128xf32>
    %217 = arith.negf %216 : vector<2x128xf32>
    %218 = math.exp %217 : vector<2x128xf32>
    %cst_49 = arith.constant 1.000000e+00 : f32
    %219 = vector.broadcast %cst_49 : f32 to vector<2x128xf32>
    %220 = arith.addf %219, %218 : vector<2x128xf32>
    %221 = arith.divf %219, %220 : vector<2x128xf32>
    %222 = math.tanh %216 : vector<2x128xf32>
    %223 = vector.extract_strided_slice %221 {offsets = [0, 0], sizes = [2, 32], strides = [1, 1]} : vector<2x128xf32> to vector<2x32xf32>
    %224 = vector.extract_strided_slice %221 {offsets = [0, 32], sizes = [2, 32], strides = [1, 1]} : vector<2x128xf32> to vector<2x32xf32>
    %225 = vector.extract_strided_slice %222 {offsets = [0, 64], sizes = [2, 32], strides = [1, 1]} : vector<2x128xf32> to vector<2x32xf32>
    %226 = vector.extract_strided_slice %221 {offsets = [0, 96], sizes = [2, 32], strides = [1, 1]} : vector<2x128xf32> to vector<2x32xf32>
    %227 = arith.mulf %224, %188 : vector<2x32xf32>
    %228 = arith.mulf %223, %225 : vector<2x32xf32>
    %229 = arith.addf %227, %228 : vector<2x32xf32>
    %230 = math.tanh %229 : vector<2x32xf32>
    %231 = arith.mulf %226, %230 : vector<2x32xf32>
    %232 = arith.truncf %231 : vector<2x32xf32> to vector<2x32xbf16>
    %cst_50 = arith.constant dense<0.000000e+00> : vector<2x128xf32>
    %233 = tpu.matmul %232, %14, %cst_50 {dimension_numbers = #tpu.dot_dimension_numbers<[1], [0], [0], [1], [0, 0, 1, 1], [], []>} : vector<2x32xbf16>, vector<32x128xbf16>, vector<2x128xf32> -> vector<2x128xf32>
    %234 = vector.broadcast %15 : vector<1x128xf32> to vector<2x128xf32>
    %235 = arith.addf %233, %234 : vector<2x128xf32>
    %cst_51 = arith.constant dense<0xFF800000> : vector<2xf32>
    %236 = vector.multi_reduction <maximumf>, %235, %cst_51 [1] : vector<2x128xf32> to vector<2xf32>
    %237 = vector.shape_cast %236 : vector<2xf32> to vector<2x1xf32>
    %238 = vector.broadcast %237 : vector<2x1xf32> to vector<2x128xf32>
    %239 = arith.subf %235, %238 : vector<2x128xf32>
    %240 = math.exp %239 : vector<2x128xf32>
    %cst_52 = arith.constant dense<0.000000e+00> : vector<2xf32>
    %241 = vector.multi_reduction <add>, %240, %cst_52 [1] : vector<2x128xf32> to vector<2xf32>
    %242 = vector.shape_cast %241 : vector<2xf32> to vector<2x1xf32>
    %243 = math.log %242 : vector<2x1xf32>
    %244 = arith.addf %237, %243 : vector<2x1xf32>
    %c2 = arith.constant 2 : index
    %c0_53 = arith.constant 0 : index
    %245 = vector.load %arg10[%c2, %c0_53] : memref<16x1xi32, #tpu.memory_space<vmem>>, vector<2x1xi32>
    %246 = vector.broadcast %245 : vector<2x1xi32> to vector<2x128xi32>
    %247 = arith.cmpi eq, %170, %246 : vector<2x128xi32>
    %cst_54 = arith.constant 0.000000e+00 : f32
    %248 = vector.broadcast %cst_54 : f32 to vector<2x128xf32>
    %249 = arith.select %247, %235, %248 : vector<2x128xi1>, vector<2x128xf32>
    %cst_55 = arith.constant dense<0.000000e+00> : vector<2xf32>
    %250 = vector.multi_reduction <add>, %249, %cst_55 [1] : vector<2x128xf32> to vector<2xf32>
    %251 = vector.shape_cast %250 : vector<2xf32> to vector<2x1xf32>
    %252 = arith.subf %244, %251 : vector<2x1xf32>
    %253 = arith.addf %212, %252 : vector<2x1xf32>
    %254 = vector.extract_strided_slice %11 {offsets = [4, 0], sizes = [2, 128], strides = [1, 1]} : vector<16x128xf32> to vector<2x128xf32>
    %255 = arith.truncf %231 : vector<2x32xf32> to vector<2x32xbf16>
    %cst_56 = arith.constant dense<0.000000e+00> : vector<2x128xf32>
    %256 = tpu.matmul %255, %13, %cst_56 {dimension_numbers = #tpu.dot_dimension_numbers<[1], [0], [0], [1], [0, 0, 1, 1], [], []>} : vector<2x32xbf16>, vector<32x128xbf16>, vector<2x128xf32> -> vector<2x128xf32>
    %257 = arith.addf %254, %256 : vector<2x128xf32>
    %258 = arith.negf %257 : vector<2x128xf32>
    %259 = math.exp %258 : vector<2x128xf32>
    %cst_57 = arith.constant 1.000000e+00 : f32
    %260 = vector.broadcast %cst_57 : f32 to vector<2x128xf32>
    %261 = arith.addf %260, %259 : vector<2x128xf32>
    %262 = arith.divf %260, %261 : vector<2x128xf32>
    %263 = math.tanh %257 : vector<2x128xf32>
    %264 = vector.extract_strided_slice %262 {offsets = [0, 0], sizes = [2, 32], strides = [1, 1]} : vector<2x128xf32> to vector<2x32xf32>
    %265 = vector.extract_strided_slice %262 {offsets = [0, 32], sizes = [2, 32], strides = [1, 1]} : vector<2x128xf32> to vector<2x32xf32>
    %266 = vector.extract_strided_slice %263 {offsets = [0, 64], sizes = [2, 32], strides = [1, 1]} : vector<2x128xf32> to vector<2x32xf32>
    %267 = vector.extract_strided_slice %262 {offsets = [0, 96], sizes = [2, 32], strides = [1, 1]} : vector<2x128xf32> to vector<2x32xf32>
    %268 = arith.mulf %265, %229 : vector<2x32xf32>
    %269 = arith.mulf %264, %266 : vector<2x32xf32>
    %270 = arith.addf %268, %269 : vector<2x32xf32>
    %271 = math.tanh %270 : vector<2x32xf32>
    %272 = arith.mulf %267, %271 : vector<2x32xf32>
    %273 = arith.truncf %272 : vector<2x32xf32> to vector<2x32xbf16>
    %cst_58 = arith.constant dense<0.000000e+00> : vector<2x128xf32>
    %274 = tpu.matmul %273, %14, %cst_58 {dimension_numbers = #tpu.dot_dimension_numbers<[1], [0], [0], [1], [0, 0, 1, 1], [], []>} : vector<2x32xbf16>, vector<32x128xbf16>, vector<2x128xf32> -> vector<2x128xf32>
    %275 = vector.broadcast %15 : vector<1x128xf32> to vector<2x128xf32>
    %276 = arith.addf %274, %275 : vector<2x128xf32>
    %cst_59 = arith.constant dense<0xFF800000> : vector<2xf32>
    %277 = vector.multi_reduction <maximumf>, %276, %cst_59 [1] : vector<2x128xf32> to vector<2xf32>
    %278 = vector.shape_cast %277 : vector<2xf32> to vector<2x1xf32>
    %279 = vector.broadcast %278 : vector<2x1xf32> to vector<2x128xf32>
    %280 = arith.subf %276, %279 : vector<2x128xf32>
    %281 = math.exp %280 : vector<2x128xf32>
    %cst_60 = arith.constant dense<0.000000e+00> : vector<2xf32>
    %282 = vector.multi_reduction <add>, %281, %cst_60 [1] : vector<2x128xf32> to vector<2xf32>
    %283 = vector.shape_cast %282 : vector<2xf32> to vector<2x1xf32>
    %284 = math.log %283 : vector<2x1xf32>
    %285 = arith.addf %278, %284 : vector<2x1xf32>
    %c4 = arith.constant 4 : index
    %c0_61 = arith.constant 0 : index
    %286 = vector.load %arg10[%c4, %c0_61] : memref<16x1xi32, #tpu.memory_space<vmem>>, vector<2x1xi32>
    %287 = vector.broadcast %286 : vector<2x1xi32> to vector<2x128xi32>
    %288 = arith.cmpi eq, %170, %287 : vector<2x128xi32>
    %cst_62 = arith.constant 0.000000e+00 : f32
    %289 = vector.broadcast %cst_62 : f32 to vector<2x128xf32>
    %290 = arith.select %288, %276, %289 : vector<2x128xi1>, vector<2x128xf32>
    %cst_63 = arith.constant dense<0.000000e+00> : vector<2xf32>
    %291 = vector.multi_reduction <add>, %290, %cst_63 [1] : vector<2x128xf32> to vector<2xf32>
    %292 = vector.shape_cast %291 : vector<2xf32> to vector<2x1xf32>
    %293 = arith.subf %285, %292 : vector<2x1xf32>
    %294 = arith.addf %253, %293 : vector<2x1xf32>
    %295 = vector.extract_strided_slice %11 {offsets = [6, 0], sizes = [2, 128], strides = [1, 1]} : vector<16x128xf32> to vector<2x128xf32>
    %296 = arith.truncf %272 : vector<2x32xf32> to vector<2x32xbf16>
    %cst_64 = arith.constant dense<0.000000e+00> : vector<2x128xf32>
    %297 = tpu.matmul %296, %13, %cst_64 {dimension_numbers = #tpu.dot_dimension_numbers<[1], [0], [0], [1], [0, 0, 1, 1], [], []>} : vector<2x32xbf16>, vector<32x128xbf16>, vector<2x128xf32> -> vector<2x128xf32>
    %298 = arith.addf %295, %297 : vector<2x128xf32>
    %299 = arith.negf %298 : vector<2x128xf32>
    %300 = math.exp %299 : vector<2x128xf32>
    %cst_65 = arith.constant 1.000000e+00 : f32
    %301 = vector.broadcast %cst_65 : f32 to vector<2x128xf32>
    %302 = arith.addf %301, %300 : vector<2x128xf32>
    %303 = arith.divf %301, %302 : vector<2x128xf32>
    %304 = math.tanh %298 : vector<2x128xf32>
    %305 = vector.extract_strided_slice %303 {offsets = [0, 0], sizes = [2, 32], strides = [1, 1]} : vector<2x128xf32> to vector<2x32xf32>
    %306 = vector.extract_strided_slice %303 {offsets = [0, 32], sizes = [2, 32], strides = [1, 1]} : vector<2x128xf32> to vector<2x32xf32>
    %307 = vector.extract_strided_slice %304 {offsets = [0, 64], sizes = [2, 32], strides = [1, 1]} : vector<2x128xf32> to vector<2x32xf32>
    %308 = vector.extract_strided_slice %303 {offsets = [0, 96], sizes = [2, 32], strides = [1, 1]} : vector<2x128xf32> to vector<2x32xf32>
    %309 = arith.mulf %306, %270 : vector<2x32xf32>
    %310 = arith.mulf %305, %307 : vector<2x32xf32>
    %311 = arith.addf %309, %310 : vector<2x32xf32>
    %312 = math.tanh %311 : vector<2x32xf32>
    %313 = arith.mulf %308, %312 : vector<2x32xf32>
    %314 = arith.truncf %313 : vector<2x32xf32> to vector<2x32xbf16>
    %cst_66 = arith.constant dense<0.000000e+00> : vector<2x128xf32>
    %315 = tpu.matmul %314, %14, %cst_66 {dimension_numbers = #tpu.dot_dimension_numbers<[1], [0], [0], [1], [0, 0, 1, 1], [], []>} : vector<2x32xbf16>, vector<32x128xbf16>, vector<2x128xf32> -> vector<2x128xf32>
    %316 = vector.broadcast %15 : vector<1x128xf32> to vector<2x128xf32>
    %317 = arith.addf %315, %316 : vector<2x128xf32>
    %cst_67 = arith.constant dense<0xFF800000> : vector<2xf32>
    %318 = vector.multi_reduction <maximumf>, %317, %cst_67 [1] : vector<2x128xf32> to vector<2xf32>
    %319 = vector.shape_cast %318 : vector<2xf32> to vector<2x1xf32>
    %320 = vector.broadcast %319 : vector<2x1xf32> to vector<2x128xf32>
    %321 = arith.subf %317, %320 : vector<2x128xf32>
    %322 = math.exp %321 : vector<2x128xf32>
    %cst_68 = arith.constant dense<0.000000e+00> : vector<2xf32>
    %323 = vector.multi_reduction <add>, %322, %cst_68 [1] : vector<2x128xf32> to vector<2xf32>
    %324 = vector.shape_cast %323 : vector<2xf32> to vector<2x1xf32>
    %325 = math.log %324 : vector<2x1xf32>
    %326 = arith.addf %319, %325 : vector<2x1xf32>
    %c6 = arith.constant 6 : index
    %c0_69 = arith.constant 0 : index
    %327 = vector.load %arg10[%c6, %c0_69] : memref<16x1xi32, #tpu.memory_space<vmem>>, vector<2x1xi32>
    %328 = vector.broadcast %327 : vector<2x1xi32> to vector<2x128xi32>
    %329 = arith.cmpi eq, %170, %328 : vector<2x128xi32>
    %cst_70 = arith.constant 0.000000e+00 : f32
    %330 = vector.broadcast %cst_70 : f32 to vector<2x128xf32>
    %331 = arith.select %329, %317, %330 : vector<2x128xi1>, vector<2x128xf32>
    %cst_71 = arith.constant dense<0.000000e+00> : vector<2xf32>
    %332 = vector.multi_reduction <add>, %331, %cst_71 [1] : vector<2x128xf32> to vector<2xf32>
    %333 = vector.shape_cast %332 : vector<2xf32> to vector<2x1xf32>
    %334 = arith.subf %326, %333 : vector<2x1xf32>
    %335 = arith.addf %294, %334 : vector<2x1xf32>
    %336 = vector.extract_strided_slice %11 {offsets = [8, 0], sizes = [2, 128], strides = [1, 1]} : vector<16x128xf32> to vector<2x128xf32>
    %337 = arith.truncf %313 : vector<2x32xf32> to vector<2x32xbf16>
    %cst_72 = arith.constant dense<0.000000e+00> : vector<2x128xf32>
    %338 = tpu.matmul %337, %13, %cst_72 {dimension_numbers = #tpu.dot_dimension_numbers<[1], [0], [0], [1], [0, 0, 1, 1], [], []>} : vector<2x32xbf16>, vector<32x128xbf16>, vector<2x128xf32> -> vector<2x128xf32>
    %339 = arith.addf %336, %338 : vector<2x128xf32>
    %340 = arith.negf %339 : vector<2x128xf32>
    %341 = math.exp %340 : vector<2x128xf32>
    %cst_73 = arith.constant 1.000000e+00 : f32
    %342 = vector.broadcast %cst_73 : f32 to vector<2x128xf32>
    %343 = arith.addf %342, %341 : vector<2x128xf32>
    %344 = arith.divf %342, %343 : vector<2x128xf32>
    %345 = math.tanh %339 : vector<2x128xf32>
    %346 = vector.extract_strided_slice %344 {offsets = [0, 0], sizes = [2, 32], strides = [1, 1]} : vector<2x128xf32> to vector<2x32xf32>
    %347 = vector.extract_strided_slice %344 {offsets = [0, 32], sizes = [2, 32], strides = [1, 1]} : vector<2x128xf32> to vector<2x32xf32>
    %348 = vector.extract_strided_slice %345 {offsets = [0, 64], sizes = [2, 32], strides = [1, 1]} : vector<2x128xf32> to vector<2x32xf32>
    %349 = vector.extract_strided_slice %344 {offsets = [0, 96], sizes = [2, 32], strides = [1, 1]} : vector<2x128xf32> to vector<2x32xf32>
    %350 = arith.mulf %347, %311 : vector<2x32xf32>
    %351 = arith.mulf %346, %348 : vector<2x32xf32>
    %352 = arith.addf %350, %351 : vector<2x32xf32>
    %353 = math.tanh %352 : vector<2x32xf32>
    %354 = arith.mulf %349, %353 : vector<2x32xf32>
    %355 = arith.truncf %354 : vector<2x32xf32> to vector<2x32xbf16>
    %cst_74 = arith.constant dense<0.000000e+00> : vector<2x128xf32>
    %356 = tpu.matmul %355, %14, %cst_74 {dimension_numbers = #tpu.dot_dimension_numbers<[1], [0], [0], [1], [0, 0, 1, 1], [], []>} : vector<2x32xbf16>, vector<32x128xbf16>, vector<2x128xf32> -> vector<2x128xf32>
    %357 = vector.broadcast %15 : vector<1x128xf32> to vector<2x128xf32>
    %358 = arith.addf %356, %357 : vector<2x128xf32>
    %cst_75 = arith.constant dense<0xFF800000> : vector<2xf32>
    %359 = vector.multi_reduction <maximumf>, %358, %cst_75 [1] : vector<2x128xf32> to vector<2xf32>
    %360 = vector.shape_cast %359 : vector<2xf32> to vector<2x1xf32>
    %361 = vector.broadcast %360 : vector<2x1xf32> to vector<2x128xf32>
    %362 = arith.subf %358, %361 : vector<2x128xf32>
    %363 = math.exp %362 : vector<2x128xf32>
    %cst_76 = arith.constant dense<0.000000e+00> : vector<2xf32>
    %364 = vector.multi_reduction <add>, %363, %cst_76 [1] : vector<2x128xf32> to vector<2xf32>
    %365 = vector.shape_cast %364 : vector<2xf32> to vector<2x1xf32>
    %366 = math.log %365 : vector<2x1xf32>
    %367 = arith.addf %360, %366 : vector<2x1xf32>
    %c8 = arith.constant 8 : index
    %c0_77 = arith.constant 0 : index
    %368 = vector.load %arg10[%c8, %c0_77] : memref<16x1xi32, #tpu.memory_space<vmem>>, vector<2x1xi32>
    %369 = vector.broadcast %368 : vector<2x1xi32> to vector<2x128xi32>
    %370 = arith.cmpi eq, %170, %369 : vector<2x128xi32>
    %cst_78 = arith.constant 0.000000e+00 : f32
    %371 = vector.broadcast %cst_78 : f32 to vector<2x128xf32>
    %372 = arith.select %370, %358, %371 : vector<2x128xi1>, vector<2x128xf32>
    %cst_79 = arith.constant dense<0.000000e+00> : vector<2xf32>
    %373 = vector.multi_reduction <add>, %372, %cst_79 [1] : vector<2x128xf32> to vector<2xf32>
    %374 = vector.shape_cast %373 : vector<2xf32> to vector<2x1xf32>
    %375 = arith.subf %367, %374 : vector<2x1xf32>
    %376 = arith.addf %335, %375 : vector<2x1xf32>
    %377 = vector.extract_strided_slice %11 {offsets = [10, 0], sizes = [2, 128], strides = [1, 1]} : vector<16x128xf32> to vector<2x128xf32>
    %378 = arith.truncf %354 : vector<2x32xf32> to vector<2x32xbf16>
    %cst_80 = arith.constant dense<0.000000e+00> : vector<2x128xf32>
    %379 = tpu.matmul %378, %13, %cst_80 {dimension_numbers = #tpu.dot_dimension_numbers<[1], [0], [0], [1], [0, 0, 1, 1], [], []>} : vector<2x32xbf16>, vector<32x128xbf16>, vector<2x128xf32> -> vector<2x128xf32>
    %380 = arith.addf %377, %379 : vector<2x128xf32>
    %381 = arith.negf %380 : vector<2x128xf32>
    %382 = math.exp %381 : vector<2x128xf32>
    %cst_81 = arith.constant 1.000000e+00 : f32
    %383 = vector.broadcast %cst_81 : f32 to vector<2x128xf32>
    %384 = arith.addf %383, %382 : vector<2x128xf32>
    %385 = arith.divf %383, %384 : vector<2x128xf32>
    %386 = math.tanh %380 : vector<2x128xf32>
    %387 = vector.extract_strided_slice %385 {offsets = [0, 0], sizes = [2, 32], strides = [1, 1]} : vector<2x128xf32> to vector<2x32xf32>
    %388 = vector.extract_strided_slice %385 {offsets = [0, 32], sizes = [2, 32], strides = [1, 1]} : vector<2x128xf32> to vector<2x32xf32>
    %389 = vector.extract_strided_slice %386 {offsets = [0, 64], sizes = [2, 32], strides = [1, 1]} : vector<2x128xf32> to vector<2x32xf32>
    %390 = vector.extract_strided_slice %385 {offsets = [0, 96], sizes = [2, 32], strides = [1, 1]} : vector<2x128xf32> to vector<2x32xf32>
    %391 = arith.mulf %388, %352 : vector<2x32xf32>
    %392 = arith.mulf %387, %389 : vector<2x32xf32>
    %393 = arith.addf %391, %392 : vector<2x32xf32>
    %394 = math.tanh %393 : vector<2x32xf32>
    %395 = arith.mulf %390, %394 : vector<2x32xf32>
    %396 = arith.truncf %395 : vector<2x32xf32> to vector<2x32xbf16>
    %cst_82 = arith.constant dense<0.000000e+00> : vector<2x128xf32>
    %397 = tpu.matmul %396, %14, %cst_82 {dimension_numbers = #tpu.dot_dimension_numbers<[1], [0], [0], [1], [0, 0, 1, 1], [], []>} : vector<2x32xbf16>, vector<32x128xbf16>, vector<2x128xf32> -> vector<2x128xf32>
    %398 = vector.broadcast %15 : vector<1x128xf32> to vector<2x128xf32>
    %399 = arith.addf %397, %398 : vector<2x128xf32>
    %cst_83 = arith.constant dense<0xFF800000> : vector<2xf32>
    %400 = vector.multi_reduction <maximumf>, %399, %cst_83 [1] : vector<2x128xf32> to vector<2xf32>
    %401 = vector.shape_cast %400 : vector<2xf32> to vector<2x1xf32>
    %402 = vector.broadcast %401 : vector<2x1xf32> to vector<2x128xf32>
    %403 = arith.subf %399, %402 : vector<2x128xf32>
    %404 = math.exp %403 : vector<2x128xf32>
    %cst_84 = arith.constant dense<0.000000e+00> : vector<2xf32>
    %405 = vector.multi_reduction <add>, %404, %cst_84 [1] : vector<2x128xf32> to vector<2xf32>
    %406 = vector.shape_cast %405 : vector<2xf32> to vector<2x1xf32>
    %407 = math.log %406 : vector<2x1xf32>
    %408 = arith.addf %401, %407 : vector<2x1xf32>
    %c10 = arith.constant 10 : index
    %c0_85 = arith.constant 0 : index
    %409 = vector.load %arg10[%c10, %c0_85] : memref<16x1xi32, #tpu.memory_space<vmem>>, vector<2x1xi32>
    %410 = vector.broadcast %409 : vector<2x1xi32> to vector<2x128xi32>
    %411 = arith.cmpi eq, %170, %410 : vector<2x128xi32>
    %cst_86 = arith.constant 0.000000e+00 : f32
    %412 = vector.broadcast %cst_86 : f32 to vector<2x128xf32>
    %413 = arith.select %411, %399, %412 : vector<2x128xi1>, vector<2x128xf32>
    %cst_87 = arith.constant dense<0.000000e+00> : vector<2xf32>
    %414 = vector.multi_reduction <add>, %413, %cst_87 [1] : vector<2x128xf32> to vector<2xf32>
    %415 = vector.shape_cast %414 : vector<2xf32> to vector<2x1xf32>
    %416 = arith.subf %408, %415 : vector<2x1xf32>
    %417 = arith.addf %376, %416 : vector<2x1xf32>
    %418 = vector.extract_strided_slice %11 {offsets = [12, 0], sizes = [2, 128], strides = [1, 1]} : vector<16x128xf32> to vector<2x128xf32>
    %419 = arith.truncf %395 : vector<2x32xf32> to vector<2x32xbf16>
    %cst_88 = arith.constant dense<0.000000e+00> : vector<2x128xf32>
    %420 = tpu.matmul %419, %13, %cst_88 {dimension_numbers = #tpu.dot_dimension_numbers<[1], [0], [0], [1], [0, 0, 1, 1], [], []>} : vector<2x32xbf16>, vector<32x128xbf16>, vector<2x128xf32> -> vector<2x128xf32>
    %421 = arith.addf %418, %420 : vector<2x128xf32>
    %422 = arith.negf %421 : vector<2x128xf32>
    %423 = math.exp %422 : vector<2x128xf32>
    %cst_89 = arith.constant 1.000000e+00 : f32
    %424 = vector.broadcast %cst_89 : f32 to vector<2x128xf32>
    %425 = arith.addf %424, %423 : vector<2x128xf32>
    %426 = arith.divf %424, %425 : vector<2x128xf32>
    %427 = math.tanh %421 : vector<2x128xf32>
    %428 = vector.extract_strided_slice %426 {offsets = [0, 0], sizes = [2, 32], strides = [1, 1]} : vector<2x128xf32> to vector<2x32xf32>
    %429 = vector.extract_strided_slice %426 {offsets = [0, 32], sizes = [2, 32], strides = [1, 1]} : vector<2x128xf32> to vector<2x32xf32>
    %430 = vector.extract_strided_slice %427 {offsets = [0, 64], sizes = [2, 32], strides = [1, 1]} : vector<2x128xf32> to vector<2x32xf32>
    %431 = vector.extract_strided_slice %426 {offsets = [0, 96], sizes = [2, 32], strides = [1, 1]} : vector<2x128xf32> to vector<2x32xf32>
    %432 = arith.mulf %429, %393 : vector<2x32xf32>
    %433 = arith.mulf %428, %430 : vector<2x32xf32>
    %434 = arith.addf %432, %433 : vector<2x32xf32>
    %435 = math.tanh %434 : vector<2x32xf32>
    %436 = arith.mulf %431, %435 : vector<2x32xf32>
    %437 = arith.truncf %436 : vector<2x32xf32> to vector<2x32xbf16>
    %cst_90 = arith.constant dense<0.000000e+00> : vector<2x128xf32>
    %438 = tpu.matmul %437, %14, %cst_90 {dimension_numbers = #tpu.dot_dimension_numbers<[1], [0], [0], [1], [0, 0, 1, 1], [], []>} : vector<2x32xbf16>, vector<32x128xbf16>, vector<2x128xf32> -> vector<2x128xf32>
    %439 = vector.broadcast %15 : vector<1x128xf32> to vector<2x128xf32>
    %440 = arith.addf %438, %439 : vector<2x128xf32>
    %cst_91 = arith.constant dense<0xFF800000> : vector<2xf32>
    %441 = vector.multi_reduction <maximumf>, %440, %cst_91 [1] : vector<2x128xf32> to vector<2xf32>
    %442 = vector.shape_cast %441 : vector<2xf32> to vector<2x1xf32>
    %443 = vector.broadcast %442 : vector<2x1xf32> to vector<2x128xf32>
    %444 = arith.subf %440, %443 : vector<2x128xf32>
    %445 = math.exp %444 : vector<2x128xf32>
    %cst_92 = arith.constant dense<0.000000e+00> : vector<2xf32>
    %446 = vector.multi_reduction <add>, %445, %cst_92 [1] : vector<2x128xf32> to vector<2xf32>
    %447 = vector.shape_cast %446 : vector<2xf32> to vector<2x1xf32>
    %448 = math.log %447 : vector<2x1xf32>
    %449 = arith.addf %442, %448 : vector<2x1xf32>
    %c12 = arith.constant 12 : index
    %c0_93 = arith.constant 0 : index
    %450 = vector.load %arg10[%c12, %c0_93] : memref<16x1xi32, #tpu.memory_space<vmem>>, vector<2x1xi32>
    %451 = vector.broadcast %450 : vector<2x1xi32> to vector<2x128xi32>
    %452 = arith.cmpi eq, %170, %451 : vector<2x128xi32>
    %cst_94 = arith.constant 0.000000e+00 : f32
    %453 = vector.broadcast %cst_94 : f32 to vector<2x128xf32>
    %454 = arith.select %452, %440, %453 : vector<2x128xi1>, vector<2x128xf32>
    %cst_95 = arith.constant dense<0.000000e+00> : vector<2xf32>
    %455 = vector.multi_reduction <add>, %454, %cst_95 [1] : vector<2x128xf32> to vector<2xf32>
    %456 = vector.shape_cast %455 : vector<2xf32> to vector<2x1xf32>
    %457 = arith.subf %449, %456 : vector<2x1xf32>
    %458 = arith.addf %417, %457 : vector<2x1xf32>
    %459 = vector.extract_strided_slice %11 {offsets = [14, 0], sizes = [2, 128], strides = [1, 1]} : vector<16x128xf32> to vector<2x128xf32>
    %460 = arith.truncf %436 : vector<2x32xf32> to vector<2x32xbf16>
    %cst_96 = arith.constant dense<0.000000e+00> : vector<2x128xf32>
    %461 = tpu.matmul %460, %13, %cst_96 {dimension_numbers = #tpu.dot_dimension_numbers<[1], [0], [0], [1], [0, 0, 1, 1], [], []>} : vector<2x32xbf16>, vector<32x128xbf16>, vector<2x128xf32> -> vector<2x128xf32>
    %462 = arith.addf %459, %461 : vector<2x128xf32>
    %463 = arith.negf %462 : vector<2x128xf32>
    %464 = math.exp %463 : vector<2x128xf32>
    %cst_97 = arith.constant 1.000000e+00 : f32
    %465 = vector.broadcast %cst_97 : f32 to vector<2x128xf32>
    %466 = arith.addf %465, %464 : vector<2x128xf32>
    %467 = arith.divf %465, %466 : vector<2x128xf32>
    %468 = math.tanh %462 : vector<2x128xf32>
    %469 = vector.extract_strided_slice %467 {offsets = [0, 0], sizes = [2, 32], strides = [1, 1]} : vector<2x128xf32> to vector<2x32xf32>
    %470 = vector.extract_strided_slice %467 {offsets = [0, 32], sizes = [2, 32], strides = [1, 1]} : vector<2x128xf32> to vector<2x32xf32>
    %471 = vector.extract_strided_slice %468 {offsets = [0, 64], sizes = [2, 32], strides = [1, 1]} : vector<2x128xf32> to vector<2x32xf32>
    %472 = vector.extract_strided_slice %467 {offsets = [0, 96], sizes = [2, 32], strides = [1, 1]} : vector<2x128xf32> to vector<2x32xf32>
    %473 = arith.mulf %470, %434 : vector<2x32xf32>
    %474 = arith.mulf %469, %471 : vector<2x32xf32>
    %475 = arith.addf %473, %474 : vector<2x32xf32>
    %476 = math.tanh %475 : vector<2x32xf32>
    %477 = arith.mulf %472, %476 : vector<2x32xf32>
    %478 = arith.truncf %477 : vector<2x32xf32> to vector<2x32xbf16>
    %cst_98 = arith.constant dense<0.000000e+00> : vector<2x128xf32>
    %479 = tpu.matmul %478, %14, %cst_98 {dimension_numbers = #tpu.dot_dimension_numbers<[1], [0], [0], [1], [0, 0, 1, 1], [], []>} : vector<2x32xbf16>, vector<32x128xbf16>, vector<2x128xf32> -> vector<2x128xf32>
    %480 = vector.broadcast %15 : vector<1x128xf32> to vector<2x128xf32>
    %481 = arith.addf %479, %480 : vector<2x128xf32>
    %cst_99 = arith.constant dense<0xFF800000> : vector<2xf32>
    %482 = vector.multi_reduction <maximumf>, %481, %cst_99 [1] : vector<2x128xf32> to vector<2xf32>
    %483 = vector.shape_cast %482 : vector<2xf32> to vector<2x1xf32>
    %484 = vector.broadcast %483 : vector<2x1xf32> to vector<2x128xf32>
    %485 = arith.subf %481, %484 : vector<2x128xf32>
    %486 = math.exp %485 : vector<2x128xf32>
    %cst_100 = arith.constant dense<0.000000e+00> : vector<2xf32>
    %487 = vector.multi_reduction <add>, %486, %cst_100 [1] : vector<2x128xf32> to vector<2xf32>
    %488 = vector.shape_cast %487 : vector<2xf32> to vector<2x1xf32>
    %489 = math.log %488 : vector<2x1xf32>
    %490 = arith.addf %483, %489 : vector<2x1xf32>
    %c14 = arith.constant 14 : index
    %c0_101 = arith.constant 0 : index
    %491 = vector.load %arg10[%c14, %c0_101] : memref<16x1xi32, #tpu.memory_space<vmem>>, vector<2x1xi32>
    %492 = vector.broadcast %491 : vector<2x1xi32> to vector<2x128xi32>
    %493 = arith.cmpi eq, %170, %492 : vector<2x128xi32>
    %cst_102 = arith.constant 0.000000e+00 : f32
    %494 = vector.broadcast %cst_102 : f32 to vector<2x128xf32>
    %495 = arith.select %493, %481, %494 : vector<2x128xi1>, vector<2x128xf32>
    %cst_103 = arith.constant dense<0.000000e+00> : vector<2xf32>
    %496 = vector.multi_reduction <add>, %495, %cst_103 [1] : vector<2x128xf32> to vector<2xf32>
    %497 = vector.shape_cast %496 : vector<2xf32> to vector<2x1xf32>
    %498 = arith.subf %490, %497 : vector<2x1xf32>
    %499 = arith.addf %458, %498 : vector<2x1xf32>
    %cst_104 = arith.constant dense<0.000000e+00> : vector<1xf32>
    %500 = vector.multi_reduction <add>, %499, %cst_104 [0] : vector<2x1xf32> to vector<1xf32>
    %501 = vector.shape_cast %500 : vector<1xf32> to vector<1x1xf32>
    %cst_105 = arith.constant 6.250000e-02 : f32
    %502 = vector.broadcast %cst_105 : f32 to vector<1x1xf32>
    %503 = arith.mulf %501, %502 : vector<1x1xf32>
    %c0_106 = arith.constant 0 : index
    %c0_107 = arith.constant 0 : index
    %504 = vector.load %arg11[%c0_106, %c0_107] : memref<1x1xf32, #tpu.memory_space<vmem>>, vector<1x1xf32>
    tpu.vector_store %arg11[%c0_106, %c0_107], %503 {strides = array<i32>} : memref<1x1xf32, #tpu.memory_space<vmem>>, vector<1x1xf32>,
    return
  }
}

</mosaic_0001>

<bundles_post_ra>
// kernel: seq2seq_loss.1
= control target key start
LH: loop header
LB: loop body
LE: loop exit
PB: predicated region body
PF: predicated region fallthrough
CT: control target
= control target key end

     0   :  { %v2569_v1 = vmov 0.0   ;;  %vm2570_vm0 = vmmov 0   ;;  %v2571_v4 = vmov 0   ;;  %vm70_vm1 = vcmask 261120   ;;  %s3112_s0 = inlined_call_operand.vmem [shape: bf16[16,32], index: 0, kind: input, shape index: {}]   ;;  %s3113_s1 = inlined_call_operand.vmem [shape: bf16[16,32], index: 1, kind: input, shape index: {}]   ;;  %s3114_s2 = inlined_call_operand.vmem [shape: bf16[32,128], index: 2, kind: input, shape index: {}]   ;;  %s3115_s3 = inlined_call_operand.vmem [shape: bf16[32,128], index: 3, kind: input, shape index: {}]   ;;  %s3116_s4 = inlined_call_operand.vmem [shape: f32[1,128], index: 4, kind: input, shape index: {}]   ;;  %s3117_s5 = inlined_call_operand.vmem [shape: bf16[32,128], index: 5, kind: input, shape index: {}]   ;;  %s3118_s6 = inlined_call_operand.vmem [shape: bf16[32,128], index: 6, kind: input, shape index: {}]   ;;  %s3119_s7 = inlined_call_operand.vmem [shape: f32[1,128], index: 7, kind: input, shape index: {}]   ;;  %s3120_s8 = inlined_call_operand.vmem [shape: bf16[32,128], index: 8, kind: input, shape index: {}]   ;;  %s3121_s9 = inlined_call_operand.vmem [shape: f32[1,128], index: 9, kind: input, shape index: {}]   ;;  %s3122_s10 = inlined_call_operand.vmem [shape: s32[16,1], index: 10, kind: input, shape index: {}]   ;;  %s3123_s11 = inlined_call_operand.hbm [shape: f32[1,1], index: 11, kind: output, shape index: {}]  }
   0x1   :  { %v2373_v0 = vld [vmem:[%s3114_s2] sm:$0xff]   ;;  %2157 = vmatprep.subr.bf16.mxu0 %v2569_v1  ;;  %2165 = vmatprep.subr.bf16.mxu1 %v2569_v1  ;;  %v2374_v2 = vld [vmem:[%s3114_s2 + $0x8] sm:$0xff]  }
   0x2   :  { %2158 = vmatpush3.bf16.msra.mxu0 %v2373_v0  ;;  %2161 = vmatprep.mubr.msk.bf16.mxu0 %vm2570_vm0, %v2569_v1  ;;  %v2375_v3 = vld [vmem:[%s3112_s0] sm:$0xff]   ;;  %v2662_v6 = vld [vmem:[%s3115_s3 + $0x8] sm:$0xff]  }
   0x3   :  { %2159 = vmatprep.subr.bf16.mxu0 %v2569_v1  ;;  %2169 = vmatprep.mubr.msk.bf16.mxu1 %vm2570_vm0, %v2569_v1  ;;  %v2654_v5 = vld [vmem:[%s3115_s3] sm:$0xff]  }
   0x4   :  { %2371 = vset.pattern.permute.xlu0 %v2571_v4  ;;  %2372 = vset.pattern.permute.xlu1 %v2571_v4 }
   0x6   :  { %2160 = vmatpush3.bf16.msra.mxu0 %v2374_v2 }
   0x7   :  { %2173 = vmatprep.subr.bf16.mxu0 %v2569_v1 }
   0x9   :  { %2162 = vmatmul.mubr.msk.bf16.vlgmr.msra.gmra.mrb[0].mxu0 %vm70_vm1, %v2375_v3 }
   0xa   :  { %2174 = vmatpush3.bf16.msra.mxu0 %v2654_v5  ;;  %2177 = vmatprep.mubr.msk.bf16.mxu0 %vm2570_vm0, %v2569_v1 }
   0xb   :  { %16 = vsyncpa [#allocation3], 0  ;;  %2175 = vmatprep.subr.bf16.mxu0 %v2569_v1  ;;  %v2023_v9 = vld [vmem:[%s3116_s4] ss:$0 sm:$0xff]  ;;  %s2572_s26 = smov 64   ;;  %s2573_s4 = smov 32  }
   0xc   :  { %v2378_v29 = vld [vmem:[%s3117_s5] sm:$0xff]   ;;  %v2379_v30 = vld [vmem:[%s3117_s5 + $0x8] sm:$0xff]   ;;  %vm985_vm2 = vcmask 1041408   ;;  %vm2007_vm11 = vcmask 0  }
   0xd   :  { %2166 = vmatpush3.bf16.msra.mxu1 %v2378_v29  ;;  %v2380_v31 = vld [vmem:[%s3113_s1] sm:$0xff]  }
   0xe   :  { %2176 = vmatpush3.bf16.msra.mxu0 %v2662_v6  ;;  %2167 = vmatprep.subr.bf16.mxu1 %v2569_v1  ;;  %v2708_v36 = vld [vmem:[%s3119_s7] ss:$0 sm:$0xff] }
   0xf   :  { %2189 = vmatprep.subr.bf16.mxu0 %v2569_v1 }
  0x11   :  { %2178 = vmatmul.mubr.bf16.vlgmr.msra.gmra.mrb[4].mxu0 %v2571_v4  ;;  %2168 = vmatpush3.bf16.msra.mxu1 %v2379_v30 }
  0x12   :  { %2190 = vmatpush3.bf16.msra.mxu0 %v2654_v5  ;;  %2193 = vmatprep.mubr.msk.bf16.mxu0 %vm2570_vm0, %v2569_v1 }
  0x13   :  { %2191 = vmatprep.subr.bf16.mxu0 %v2569_v1  ;;  %2181 = vmatprep.subr.bf16.mxu1 %v2569_v1 }
  0x14   :  { %2170 = vmatmul.mubr.msk.bf16.vlgmr.msra.gmra.mrb[0].mxu1 %vm70_vm1, %v2380_v31 }
  0x15   :  { %2182 = vmatpush3.bf16.msra.mxu1 %v2654_v5  ;;  %2185 = vmatprep.mubr.msk.bf16.mxu1 %vm2570_vm0, %v2569_v1 }
  0x16   :  { %2192 = vmatpush3.bf16.msra.mxu0 %v2662_v6  ;;  %2183 = vmatprep.subr.bf16.mxu1 %v2569_v1 }
  0x17   :  { %2205 = vmatprep.subr.bf16.mxu0 %v2569_v1 }
  0x19   :  { %2184 = vmatpush3.bf16.msra.mxu1 %v2662_v6 }
  0x1a   :  { %2197 = vmatprep.subr.bf16.mxu1 %v2569_v1 }
  0xdc   :  { %v108_v7 = vpop.f32.mrb[0].mxu0 }
  0xdd   :  { %v2163_v8 = vpop.f32.mrb[1].mxu0  ;;  %v2680_v13 = vadd.f32 %v2023_v9, %v108_v7 }
  0xde   :  { %v111_v10 = vpop.f32.mrb[2].mxu0 }
  0xdf   :  { %v2678_v11 = vadd.f32 %v2023_v9, %v111_v10  ;;  %v2164_v12 = vpop.f32.mrb[3].mxu0 }
  0xe4   :  { %v251_v14 = vpop.f32.mrb[4].mxu0 }
  0xe5   :  { %v257_v15 = vadd.f32 %v251_v14, %v2680_v13  ;;  %v2179_v16 = vpop.f32.mrb[5].mxu0 }
  0xe6   :  { %v254_v17 = vpop.f32.mrb[6].mxu0 }
  0xe7   :  { %2385 = vtanh.f32 %v257_v15  ;;  %v2180_v18 = vpop.f32.mrb[7].mxu0  ;;  %v2035_v20 = vmul.f32 -1.442695, %v257_v15  ;;  %v2710_v37 = vpop.f32.mrb[0].mxu1 }
  0xe8   :  { %v2171_v38 = vpop.f32.mrb[1].mxu1 }
  0xe9   :  { %2387 = vpow2.f32 %v2035_v20  ;;  %v185_v39 = vpop.f32.mrb[2].mxu1 }
  0xea   :  { %v2713_v40 = vadd.f32 %v2708_v36, %v185_v39  ;;  %v2172_v41 = vpop.f32.mrb[3].mxu1 }
  0xf1   :  { %v2386_v19 = vpop.eup %2385 }
  0xf2   :  { %267 = vrot.lane.b32.xlu0 %v2386_v19, %s2572_s26 }
  0xf3   :  { %v2388_v21 = vpop.eup %2387 }
  0xf4   :  { %v261_v22 = vadd.f32 1.0, %v2388_v21 }
  0xf6   :  { %2389 = vrcp.f32 %v261_v22 }
 0x100   :  { %v2390_v23 = vpop.eup %2389 }
 0x101   :  { %v265_v26 = vmul.f32 0.0, %v2390_v23 }
 0x164   :  { %v268_v24 = vpop.permute.xlu0 %267 }
 0x165   :  { %v270_v25 = vmul.f32 %v2390_v23, %v268_v24 }
 0x167   :  { %272 = vrot.lane.b32.xlu0 %v270_v25, %s2573_s4 }
 0x1d9   :  { %v273_v27 = vpop.permute.xlu0 %272 }
 0x1da   :  { %v275_v28 = vadd.f32 %v273_v27, %v265_v26 }
 0x1dc   :  { %2391 = vtanh.f32 %v275_v28  ;;  %v341_v56 = vrot.slane %v275_v28, 6 }
 0x1e6   :  { %v2392_v32 = vpop.eup %2391 }
 0x1e7   :  { %278 = vrot.lane.b32.xlu1 %v2392_v32, %s2572_s26 }
 0x259   :  { %v279_v33 = vpop.permute.xlu1 %278 }
 0x25a   :  { %v281_v34 = vmul.f32 %v2390_v23, %v279_v33 }
 0x25c   :  { %v282_v35 = vpack.c.bf16 %v281_v34, %v281_v34 }
 0x25e   :  { %284 = vrot.lane.b32.xlu1 %v282_v35, %s2573_s4 }
 0x2d0   :  { %v285_v42 = vpop.permute.xlu1 %284 }
 0x2d1   :  { %2186 = vmatmul.mubr.msk.bf16.vlgmr.msra.gmra.mrb[4].mxu1 %vm70_vm1, %v285_v42 }
 0x2d2   :  { %2198 = vmatpush3.bf16.msra.mxu1 %v2654_v5  ;;  %2201 = vmatprep.mubr.msk.bf16.mxu1 %vm2570_vm0, %v2569_v1 }
 0x2d3   :  { %2199 = vmatprep.subr.bf16.mxu1 %v2569_v1 }
 0x2d6   :  { %2200 = vmatpush3.bf16.msra.mxu1 %v2662_v6 }
 0x2d7   :  { %2213 = vmatprep.subr.bf16.mxu1 %v2569_v1 }
 0x3a4   :  { %v323_v43 = vpop.f32.mrb[4].mxu1 }
 0x3a5   :  { %v330_v44 = vrot.slane %v323_v43, 6  ;;  %v2187_v45 = vpop.f32.mrb[5].mxu1 }
 0x3a6   :  { %v326_v46 = vpop.f32.mrb[6].mxu1 }
 0x3a7   :  { %v332_v47 = vadd.f32 %v330_v44, %v2680_v13  ;;  %v2188_v48 = vpop.f32.mrb[7].mxu1 }
 0x3a9   :  { %2393 = vtanh.f32 %v332_v47  ;;  %v2037_v50 = vmul.f32 -1.442695, %v332_v47 }
 0x3ab   :  { %2395 = vpow2.f32 %v2037_v50 }
 0x3b3   :  { %v2394_v49 = vpop.eup %2393 }
 0x3b4   :  { %345 = vrot.lane.b32.xlu0 %v2394_v49, %s2572_s26 }
 0x3b5   :  { %v2396_v51 = vpop.eup %2395 }
 0x3b6   :  { %v336_v52 = vadd.f32 1.0, %v2396_v51 }
 0x3b8   :  { %2397 = vrcp.f32 %v336_v52 }
 0x3c2   :  { %v2398_v53 = vpop.eup %2397 }
 0x3c3   :  { %v343_v57 = vmul.f32 %v2398_v53, %v341_v56 }
 0x426   :  { %v346_v54 = vpop.permute.xlu0 %345 }
 0x427   :  { %v348_v55 = vmul.f32 %v2398_v53, %v346_v54 }
 0x429   :  { %350 = vrot.lane.b32.xlu1 %v348_v55, %s2573_s4 }
 0x49b   :  { %v351_v58 = vpop.permute.xlu1 %350 }
 0x49c   :  { %v353_v59 = vadd.f32 %v351_v58, %v343_v57 }
 0x49e   :  { %2399 = vtanh.f32 %v353_v59  ;;  %v420_v20 = vrot.slane %v353_v59, 6 }
 0x4a8   :  { %v2400_v60 = vpop.eup %2399 }
 0x4a9   :  { %356 = vrot.lane.b32.xlu0 %v2400_v60, %s2572_s26 }
 0x51b   :  { %v357_v61 = vpop.permute.xlu0 %356 }
 0x51c   :  { %v359_v62 = vmul.f32 %v2398_v53, %v357_v61 }
 0x51e   :  { %v360_v63 = vpack.c.bf16 %v359_v62, %v359_v62 }
 0x520   :  { %v362_v0 = vrot.slane %v360_v63, 1 }
 0x522   :  { %363 = vrot.lane.b32.xlu1 %v362_v0, %s2573_s4 }
 0x594   :  { %v364_v2 = vpop.permute.xlu1 %363 }
 0x595   :  { %2194 = vmatmul.mubr.msk.bf16.vlgmr.msra.gmra.mrb[8].mxu0 %vm70_vm1, %v364_v2 }
 0x596   :  { %2206 = vmatpush3.bf16.msra.mxu0 %v2654_v5  ;;  %2209 = vmatprep.mubr.msk.bf16.mxu0 %vm2570_vm0, %v2569_v1 }
 0x597   :  { %2207 = vmatprep.subr.bf16.mxu0 %v2569_v1 }
 0x59a   :  { %2208 = vmatpush3.bf16.msra.mxu0 %v2662_v6 }
 0x59b   :  { %2221 = vmatprep.subr.bf16.mxu0 %v2569_v1 }
 0x668   :  { %v402_v3 = vpop.f32.mrb[8].mxu0 }
 0x669   :  { %v409_v4 = vrot.slane %v402_v3, 4  ;;  %v2195_v7 = vpop.f32.mrb[9].mxu0 }
 0x66a   :  { %v405_v8 = vpop.f32.mrb[10].mxu0 }
 0x66b   :  { %v411_v9 = vadd.f32 %v409_v4, %v2680_v13  ;;  %v2196_v10 = vpop.f32.mrb[11].mxu0 }
 0x66d   :  { %2401 = vtanh.f32 %v411_v9  ;;  %v2039_v14 = vmul.f32 -1.442695, %v411_v9 }
 0x66f   :  { %2403 = vpow2.f32 %v2039_v14 }
 0x677   :  { %v2402_v12 = vpop.eup %2401 }
 0x678   :  { %424 = vrot.lane.b32.xlu0 %v2402_v12, %s2572_s26 }
 0x679   :  { %v2404_v15 = vpop.eup %2403 }
 0x67a   :  { %v415_v16 = vadd.f32 1.0, %v2404_v15 }
 0x67c   :  { %2405 = vrcp.f32 %v415_v16 }
 0x686   :  { %v2406_v17 = vpop.eup %2405 }
 0x687   :  { %v422_v21 = vmul.f32 %v2406_v17, %v420_v20 }
 0x6ea   :  { %v425_v18 = vpop.permute.xlu0 %424 }
 0x6eb   :  { %v427_v19 = vmul.f32 %v2406_v17, %v425_v18 }
 0x6ed   :  { %429 = vrot.lane.b32.xlu1 %v427_v19, %s2573_s4 }
 0x75f   :  { %v430_v22 = vpop.permute.xlu1 %429 }
 0x760   :  { %v432_v23 = vadd.f32 %v430_v22, %v422_v21 }
 0x762   :  { %2407 = vtanh.f32 %v432_v23  ;;  %v499_v46 = vrot.slane %v432_v23, 6 }
 0x76c   :  { %v2408_v24 = vpop.eup %2407 }
 0x76d   :  { %435 = vrot.lane.b32.xlu0 %v2408_v24, %s2572_s26 }
 0x7df   :  { %v436_v25 = vpop.permute.xlu0 %435 }
 0x7e0   :  { %v438_v26 = vmul.f32 %v2406_v17, %v436_v25 }
 0x7e2   :  { %v439_v27 = vpack.c.bf16 %v438_v26, %v438_v26 }
 0x7e4   :  { %v441_v28 = vrot.slane %v439_v27, 2 }
 0x7e6   :  { %442 = vrot.lane.b32.xlu1 %v441_v28, %s2573_s4 }
 0x858   :  { %v443_v29 = vpop.permute.xlu1 %442 }
 0x859   :  { %2202 = vmatmul.mubr.msk.bf16.vlgmr.msra.gmra.mrb[8].mxu1 %vm70_vm1, %v443_v29 }
 0x85a   :  { %2214 = vmatpush3.bf16.msra.mxu1 %v2654_v5  ;;  %2217 = vmatprep.mubr.msk.bf16.mxu1 %vm2570_vm0, %v2569_v1 }
 0x85b   :  { %2215 = vmatprep.subr.bf16.mxu1 %v2569_v1 }
 0x85e   :  { %2216 = vmatpush3.bf16.msra.mxu1 %v2662_v6 }
 0x85f   :  { %2229 = vmatprep.subr.bf16.mxu1 %v2569_v1 }
 0x92c   :  { %v481_v30 = vpop.f32.mrb[8].mxu1 }
 0x92d   :  { %v488_v31 = vrot.slane %v481_v30, 2  ;;  %v2203_v32 = vpop.f32.mrb[9].mxu1 }
 0x92e   :  { %v484_v33 = vpop.f32.mrb[10].mxu1 }
 0x92f   :  { %v490_v34 = vadd.f32 %v488_v31, %v2680_v13  ;;  %v2204_v35 = vpop.f32.mrb[11].mxu1 }
 0x931   :  { %2409 = vtanh.f32 %v490_v34  ;;  %v2041_v39 = vmul.f32 -1.442695, %v490_v34 }
 0x933   :  { %2411 = vpow2.f32 %v2041_v39 }
 0x93b   :  { %v2410_v38 = vpop.eup %2409 }
 0x93c   :  { %503 = vrot.lane.b32.xlu0 %v2410_v38, %s2572_s26 }
 0x93d   :  { %v2412_v41 = vpop.eup %2411 }
 0x93e   :  { %v494_v42 = vadd.f32 1.0, %v2412_v41 }
 0x940   :  { %2413 = vrcp.f32 %v494_v42 }
 0x94a   :  { %v2414_v43 = vpop.eup %2413 }
 0x94b   :  { %v501_v47 = vmul.f32 %v2414_v43, %v499_v46 }
 0x9ae   :  { %v504_v44 = vpop.permute.xlu0 %503 }
 0x9af   :  { %v506_v45 = vmul.f32 %v2414_v43, %v504_v44 }
 0x9b1   :  { %508 = vrot.lane.b32.xlu1 %v506_v45, %s2573_s4 }
 0xa23   :  { %v509_v48 = vpop.permute.xlu1 %508 }
 0xa24   :  { %v511_v49 = vadd.f32 %v509_v48, %v501_v47 }
 0xa26   :  { %2415 = vtanh.f32 %v511_v49  ;;  %v575_v4 = vrot.slane %v511_v49, 6 }
 0xa30   :  { %v2416_v13 = vpop.eup %2415 }
 0xa31   :  { %514 = vrot.lane.b32.xlu0 %v2416_v13, %s2572_s26 }
 0xaa3   :  { %v515_v50 = vpop.permute.xlu0 %514 }
 0xaa4   :  { %v517_v51 = vmul.f32 %v2414_v43, %v515_v50 }
 0xaa6   :  { %v518_v52 = vpack.c.bf16 %v517_v51, %v517_v51 }
 0xaa8   :  { %v520_v53 = vrot.slane %v518_v52, 3 }
 0xaaa   :  { %521 = vrot.lane.b32.xlu1 %v520_v53, %s2573_s4 }
 0xb1c   :  { %v522_v54 = vpop.permute.xlu1 %521 }
 0xb1d   :  { %2210 = vmatmul.mubr.msk.bf16.vlgmr.msra.gmra.mrb[12].mxu0 %vm70_vm1, %v522_v54 }
 0xb1e   :  { %2222 = vmatpush3.bf16.msra.mxu0 %v2654_v5  ;;  %2225 = vmatprep.mubr.msk.bf16.mxu0 %vm2570_vm0, %v2569_v1 }
 0xb1f   :  { %2223 = vmatprep.subr.bf16.mxu0 %v2569_v1 }
 0xb22   :  { %2224 = vmatpush3.bf16.msra.mxu0 %v2662_v6 }
 0xb23   :  { %2237 = vmatprep.subr.bf16.mxu0 %v2569_v1 }
 0xbf0   :  { %v560_v55 = vpop.f32.mrb[12].mxu0 }
 0xbf1   :  { %v566_v56 = vadd.f32 %v560_v55, %v2678_v11  ;;  %v2211_v57 = vpop.f32.mrb[13].mxu0 }
 0xbf2   :  { %v563_v58 = vpop.f32.mrb[14].mxu0 }
 0xbf3   :  { %2417 = vtanh.f32 %v566_v56  ;;  %v2212_v59 = vpop.f32.mrb[15].mxu0  ;;  %v2043_v61 = vmul.f32 -1.442695, %v566_v56 }
 0xbf5   :  { %2419 = vpow2.f32 %v2043_v61 }
 0xbfd   :  { %v2418_v60 = vpop.eup %2417 }
 0xbfe   :  { %579 = vrot.lane.b32.xlu0 %v2418_v60, %s2572_s26 }
 0xbff   :  { %v2420_v62 = vpop.eup %2419 }
 0xc00   :  { %v570_v63 = vadd.f32 1.0, %v2420_v62 }
 0xc02   :  { %2421 = vrcp.f32 %v570_v63 }
 0xc0c   :  { %v2422_v0 = vpop.eup %2421 }
 0xc0d   :  { %v577_v7 = vmul.f32 %v2422_v0, %v575_v4 }
 0xc70   :  { %v580_v2 = vpop.permute.xlu0 %579 }
 0xc71   :  { %v582_v3 = vmul.f32 %v2422_v0, %v580_v2 }
 0xc73   :  { %584 = vrot.lane.b32.xlu1 %v582_v3, %s2573_s4 }
 0xce5   :  { %v585_v8 = vpop.permute.xlu1 %584 }
 0xce6   :  { %v587_v9 = vadd.f32 %v585_v8, %v577_v7 }
 0xce8   :  { %2423 = vtanh.f32 %v587_v9  ;;  %v653_v28 = vrot.slane %v587_v9, 6 }
 0xcf2   :  { %v2424_v10 = vpop.eup %2423 }
 0xcf3   :  { %590 = vrot.lane.b32.xlu0 %v2424_v10, %s2572_s26 }
 0xd65   :  { %v591_v12 = vpop.permute.xlu0 %590 }
 0xd66   :  { %v593_v14 = vmul.f32 %v2422_v0, %v591_v12 }
 0xd68   :  { %v594_v15 = vpack.c.bf16 %v593_v14, %v593_v14 }
 0xd6a   :  { %596 = vrot.lane.b32.xlu1 %v594_v15, %s2573_s4 }
 0xddc   :  { %v597_v16 = vpop.permute.xlu1 %596 }
 0xddd   :  { %2218 = vmatmul.mubr.msk.bf16.vlgmr.msra.gmra.mrb[12].mxu1 %vm70_vm1, %v597_v16 }
 0xdde   :  { %2230 = vmatpush3.bf16.msra.mxu1 %v2654_v5  ;;  %2233 = vmatprep.mubr.msk.bf16.mxu1 %vm2570_vm0, %v2569_v1 }
 0xddf   :  { %2231 = vmatprep.subr.bf16.mxu1 %v2569_v1 }
 0xde2   :  { %2232 = vmatpush3.bf16.msra.mxu1 %v2662_v6 }
 0xde3   :  { %2245 = vmatprep.subr.bf16.mxu1 %v2569_v1 }
 0xeb0   :  { %v635_v17 = vpop.f32.mrb[12].mxu1 }
 0xeb1   :  { %v642_v18 = vrot.slane %v635_v17, 6  ;;  %v2219_v19 = vpop.f32.mrb[13].mxu1 }
 0xeb2   :  { %v638_v20 = vpop.f32.mrb[14].mxu1 }
 0xeb3   :  { %v644_v21 = vadd.f32 %v642_v18, %v2678_v11  ;;  %v2220_v22 = vpop.f32.mrb[15].mxu1 }
 0xeb5   :  { %2425 = vtanh.f32 %v644_v21  ;;  %v2045_v5 = vmul.f32 -1.442695, %v644_v21  ;;  %v2798_v21 = vld [vmem:[%s3118_s6 + $0x8] sm:$0xff]  }
 0xeb7   :  { %2427 = vpow2.f32 %v2045_v5 }
 0xebf   :  { %v2426_v23 = vpop.eup %2425 }
 0xec0   :  { %657 = vrot.lane.b32.xlu0 %v2426_v23, %s2572_s26 }
 0xec1   :  { %v2428_v24 = vpop.eup %2427 }
 0xec2   :  { %v648_v25 = vadd.f32 1.0, %v2428_v24 }
 0xec4   :  { %2429 = vrcp.f32 %v648_v25 }
 0xece   :  { %v2430_v26 = vpop.eup %2429 }
 0xecf   :  { %v655_v29 = vmul.f32 %v2430_v26, %v653_v28 }
 0xf32   :  { %v658_v6 = vpop.permute.xlu0 %657 }
 0xf33   :  { %v660_v27 = vmul.f32 %v2430_v26, %v658_v6  ;;  %v2814_v6 = vadd.f32 %v2708_v36, %v2710_v37 }
 0xf35   :  { %662 = vrot.lane.b32.xlu1 %v660_v27, %s2573_s4 }
 0xfa7   :  { %v663_v30 = vpop.permute.xlu1 %662 }
 0xfa8   :  { %v665_v31 = vadd.f32 %v663_v30, %v655_v29 }
 0xfaa   :  { %2431 = vtanh.f32 %v665_v31  ;;  %v732_v53 = vrot.slane %v665_v31, 6 }
 0xfb4   :  { %v2432_v32 = vpop.eup %2431 }
 0xfb5   :  { %668 = vrot.lane.b32.xlu0 %v2432_v32, %s2572_s26 }
0x1027   :  { %v669_v33 = vpop.permute.xlu0 %668 }
0x1028   :  { %v671_v34 = vmul.f32 %v2430_v26, %v669_v33 }
0x102a   :  { %v672_v35 = vpack.c.bf16 %v671_v34, %v671_v34 }
0x102c   :  { %v674_v38 = vrot.slane %v672_v35, 1 }
0x102e   :  { %675 = vrot.lane.b32.xlu1 %v674_v38, %s2573_s4 }
0x10a0   :  { %v676_v39 = vpop.permute.xlu1 %675 }
0x10a1   :  { %2226 = vmatmul.mubr.msk.bf16.vlgmr.msra.gmra.mrb[16].mxu0 %vm70_vm1, %v676_v39 }
0x10a2   :  { %2241 = vmatprep.mubr.msk.bf16.mxu0 %vm2570_vm0, %v2569_v1 }
0x1174   :  { %v714_v41 = vpop.f32.mrb[16].mxu0 }
0x1175   :  { %v721_v42 = vrot.slane %v714_v41, 4  ;;  %v2227_v43 = vpop.f32.mrb[17].mxu0 }
0x1176   :  { %v717_v44 = vpop.f32.mrb[18].mxu0 }
0x1177   :  { %v723_v45 = vadd.f32 %v721_v42, %v2678_v11  ;;  %v2228_v46 = vpop.f32.mrb[19].mxu0  ;;  %v2822_v44 = vld [vmem:[%s3120_s8] sm:$0xff]  }
0x1179   :  { %2433 = vtanh.f32 %v723_v45  ;;  %v2047_v48 = vmul.f32 -1.442695, %v723_v45  ;;  %v2828_v45 = vld [vmem:[%s3120_s8 + $0x8] sm:$0xff]  }
0x117b   :  { %2435 = vpow2.f32 %v2047_v48 }
0x1183   :  { %v2434_v47 = vpop.eup %2433 }
0x1184   :  { %736 = vrot.lane.b32.xlu0 %v2434_v47, %s2572_s26 }
0x1185   :  { %v2436_v49 = vpop.eup %2435 }
0x1186   :  { %v727_v13 = vadd.f32 1.0, %v2436_v49 }
0x1188   :  { %2437 = vrcp.f32 %v727_v13 }
0x1192   :  { %v2438_v50 = vpop.eup %2437 }
0x1193   :  { %v734_v54 = vmul.f32 %v2438_v50, %v732_v53 }
0x11f6   :  { %v737_v51 = vpop.permute.xlu0 %736 }
0x11f7   :  { %v739_v52 = vmul.f32 %v2438_v50, %v737_v51 }
0x11f9   :  { %741 = vrot.lane.b32.xlu1 %v739_v52, %s2573_s4 }
0x126b   :  { %v742_v55 = vpop.permute.xlu1 %741 }
0x126c   :  { %v744_v56 = vadd.f32 %v742_v55, %v734_v54 }
0x126e   :  { %2439 = vtanh.f32 %v744_v56  ;;  %v811_v17 = vrot.slane %v744_v56, 6 }
0x1278   :  { %v2440_v57 = vpop.eup %2439 }
0x1279   :  { %747 = vrot.lane.b32.xlu0 %v2440_v57, %s2572_s26 }
0x12eb   :  { %v748_v58 = vpop.permute.xlu0 %747 }
0x12ec   :  { %v750_v59 = vmul.f32 %v2438_v50, %v748_v58 }
0x12ee   :  { %v751_v60 = vpack.c.bf16 %v750_v59, %v750_v59 }
0x12f0   :  { %v753_v61 = vrot.slane %v751_v60, 2 }
0x12f2   :  { %754 = vrot.lane.b32.xlu1 %v753_v61, %s2573_s4 }
0x1364   :  { %v755_v62 = vpop.permute.xlu1 %754 }
0x1365   :  { %2234 = vmatmul.mubr.msk.bf16.vlgmr.msra.gmra.mrb[16].mxu1 %vm70_vm1, %v755_v62 }
0x1366   :  { %2249 = vmatprep.mubr.msk.bf16.mxu1 %vm2570_vm0, %v2569_v1  ;;  %2246 = vmatpush3.bf16.msra.mxu1 %v2822_v44 }
0x1367   :  { %2247 = vmatprep.subr.bf16.mxu1 %v2569_v1 }
0x136a   :  { %2248 = vmatpush3.bf16.msra.mxu1 %v2828_v45 }
0x136b   :  { %2261 = vmatprep.subr.bf16.mxu1 %v2569_v1 }
0x1438   :  { %v793_v63 = vpop.f32.mrb[16].mxu1 }
0x1439   :  { %v800_v0 = vrot.slane %v793_v63, 2  ;;  %v2235_v2 = vpop.f32.mrb[17].mxu1 }
0x143a   :  { %v796_v3 = vpop.f32.mrb[18].mxu1 }
0x143b   :  { %v802_v4 = vadd.f32 %v800_v0, %v2678_v11  ;;  %v2236_v7 = vpop.f32.mrb[19].mxu1  ;;  %v2792_v11 = vld [vmem:[%s3118_s6] sm:$0xff]  }
0x143c   :  { %2238 = vmatpush3.bf16.msra.mxu0 %v2792_v11 }
0x143d   :  { %2441 = vtanh.f32 %v802_v4  ;;  %v2049_v9 = vmul.f32 -1.442695, %v802_v4  ;;  %2239 = vmatprep.subr.bf16.mxu0 %v2569_v1 }
0x143f   :  { %2443 = vpow2.f32 %v2049_v9 }
0x1440   :  { %2240 = vmatpush3.bf16.msra.mxu0 %v2798_v21 }
0x1441   :  { %2253 = vmatprep.subr.bf16.mxu0 %v2569_v1 }
0x1447   :  { %v2442_v8 = vpop.eup %2441 }
0x1448   :  { %815 = vrot.lane.b32.xlu0 %v2442_v8, %s2572_s26 }
0x1449   :  { %v2444_v10 = vpop.eup %2443 }
0x144a   :  { %v806_v12 = vadd.f32 1.0, %v2444_v10 }
0x144c   :  { %2445 = vrcp.f32 %v806_v12 }
0x1456   :  { %v2446_v14 = vpop.eup %2445 }
0x1457   :  { %v813_v18 = vmul.f32 %v2446_v14, %v811_v17 }
0x14ba   :  { %v816_v15 = vpop.permute.xlu0 %815 }
0x14bb   :  { %v818_v16 = vmul.f32 %v2446_v14, %v816_v15 }
0x14bd   :  { %820 = vrot.lane.b32.xlu1 %v818_v16, %s2573_s4 }
0x152f   :  { %v821_v19 = vpop.permute.xlu1 %820 }
0x1530   :  { %v823_v20 = vadd.f32 %v821_v19, %v813_v18 }
0x1532   :  { %2447 = vtanh.f32 %v823_v20  ;;  %v901_v36 = vrot.slane %v823_v20, 6 }
0x153c   :  { %v2448_v22 = vpop.eup %2447 }
0x153d   :  { %826 = vrot.lane.b32.xlu0 %v2448_v22, %s2572_s26 }
0x15af   :  { %v827_v23 = vpop.permute.xlu0 %826 }
0x15b0   :  { %v829_v5 = vmul.f32 %v2446_v14, %v827_v23 }
0x15b2   :  { %v832_v24 = vpack.c.bf16 %v829_v5, %v829_v5 }
0x15b4   :  { %v834_v25 = vrot.slane %v832_v24, 3 }
0x15b6   :  { %835 = vrot.lane.b32.xlu1 %v834_v25, %s2573_s4 }
0x1628   :  { %v836_v26 = vpop.permute.xlu1 %835 }
0x1629   :  { %2242 = vmatmul.mubr.msk.bf16.vlgmr.msra.gmra.mrb[20].mxu0 %vm70_vm1, %v836_v26 }
0x162a   :  { %2254 = vmatpush3.bf16.msra.mxu0 %v2792_v11  ;;  %2257 = vmatprep.mubr.msk.bf16.mxu0 %vm2570_vm0, %v2569_v1 }
0x162b   :  { %2255 = vmatprep.subr.bf16.mxu0 %v2569_v1 }
0x162e   :  { %2256 = vmatpush3.bf16.msra.mxu0 %v2798_v21 }
0x162f   :  { %2269 = vmatprep.subr.bf16.mxu0 %v2569_v1 }
0x16fc   :  { %v886_v27 = vpop.f32.mrb[20].mxu0 }
0x16fd   :  { %v892_v28 = vadd.f32 %v886_v27, %v2814_v6  ;;  %v2243_v29 = vpop.f32.mrb[21].mxu0 }
0x16fe   :  { %v889_v30 = vpop.f32.mrb[22].mxu0 }
0x16ff   :  { %2449 = vtanh.f32 %v892_v28  ;;  %v2244_v31 = vpop.f32.mrb[23].mxu0  ;;  %v2053_v33 = vmul.f32 -1.442695, %v892_v28 }
0x1701   :  { %2451 = vpow2.f32 %v2053_v33 }
0x1709   :  { %v2450_v32 = vpop.eup %2449 }
0x170a   :  { %905 = vrot.lane.b32.xlu0 %v2450_v32, %s2572_s26 }
0x170b   :  { %v2452_v34 = vpop.eup %2451 }
0x170c   :  { %v896_v35 = vadd.f32 1.0, %v2452_v34 }
0x170e   :  { %2453 = vrcp.f32 %v896_v35 }
0x1718   :  { %v2454_v38 = vpop.eup %2453 }
0x1719   :  { %v903_v37 = vmul.f32 %v2454_v38, %v901_v36 }
0x177c   :  { %v906_v39 = vpop.permute.xlu0 %905 }
0x177d   :  { %v908_v41 = vmul.f32 %v2454_v38, %v906_v39 }
0x177f   :  { %910 = vrot.lane.b32.xlu1 %v908_v41, %s2573_s4 }
0x17f1   :  { %v911_v42 = vpop.permute.xlu1 %910 }
0x17f2   :  { %v913_v43 = vadd.f32 %v911_v42, %v903_v37 }
0x17f4   :  { %2455 = vtanh.f32 %v913_v43  ;;  %v1061_v4 = vrot.slane %v913_v43, 6 }
0x17fe   :  { %v2456_v46 = vpop.eup %2455 }
0x17ff   :  { %916 = vrot.lane.b32.xlu0 %v2456_v46, %s2572_s26 }
0x1871   :  { %v917_v47 = vpop.permute.xlu0 %916 }
0x1872   :  { %v919_v48 = vmul.f32 %v2454_v38, %v917_v47 }
0x1874   :  { %v920_v49 = vpack.c.bf16 %v919_v48, %v919_v48 }
0x1876   :  { %928 = vrot.lane.b32.xlu1 %v920_v49, %s2573_s4 }
0x18e8   :  { %v929_v13 = vpop.permute.xlu1 %928 }
0x18e9   :  { %2250 = vmatmul.mubr.msk.bf16.vlgmr.msra.gmra.mrb[20].mxu1 %vm70_vm1, %v929_v13  ;;  %2258 = vmatmul.mubr.msk.bf16.vlgmr.msra.gmra.mrb[24].mxu0 %vm70_vm1, %v929_v13 }
0x18ea   :  { %2262 = vmatpush3.bf16.msra.mxu1 %v2822_v44  ;;  %2270 = vmatpush3.bf16.msra.mxu0 %v2792_v11 }
0x18eb   :  { %2263 = vmatprep.subr.bf16.mxu1 %v2569_v1  ;;  %2271 = vmatprep.subr.bf16.mxu0 %v2569_v1 }
0x18ec   :  { %2265 = vmatprep.mubr.msk.bf16.mxu1 %vm2570_vm0, %v2569_v1  ;;  %2273 = vmatprep.mubr.msk.bf16.mxu0 %vm2570_vm0, %v2569_v1 }
0x18ee   :  { %2264 = vmatpush3.bf16.msra.mxu1 %v2828_v45  ;;  %2272 = vmatpush3.bf16.msra.mxu0 %v2798_v21 }
0x18ef   :  { %2277 = vmatprep.subr.bf16.mxu1 %v2569_v1  ;;  %2285 = vmatprep.subr.bf16.mxu0 %v2569_v1 }
0x19bc   :  { %v2849_v50 = vpop.f32.mrb[20].mxu1  ;;  %v1043_v51 = vpop.f32.mrb[24].mxu0 }
0x19bd   :  { %v1050_v52 = vrot.slane %v1043_v51, 6  ;;  %v2251_v53 = vpop.f32.mrb[21].mxu1  ;;  %v2259_v54 = vpop.f32.mrb[25].mxu0 }
0x19be   :  { %v982_v55 = vpop.f32.mrb[22].mxu1  ;;  %v1046_v56 = vpop.f32.mrb[26].mxu0 }
0x19bf   :  { %v1052_v57 = vadd.f32 %v1050_v52, %v2814_v6  ;;  %v2252_v58 = vpop.f32.mrb[23].mxu1  ;;  %v2260_v59 = vpop.f32.mrb[27].mxu0 }
0x19c1   :  { %2457 = vtanh.f32 %v1052_v57  ;;  %v2059_v61 = vmul.f32 -1.442695, %v1052_v57 }
0x19c3   :  { %2459 = vpow2.f32 %v2059_v61 }
0x19cb   :  { %v2458_v60 = vpop.eup %2457 }
0x19cc   :  { %1065 = vrot.lane.b32.xlu0 %v2458_v60, %s2572_s26 }
0x19cd   :  { %v2460_v62 = vpop.eup %2459 }
0x19ce   :  { %v1056_v63 = vadd.f32 1.0, %v2460_v62 }
0x19d0   :  { %2461 = vrcp.f32 %v1056_v63 }
0x19da   :  { %v2462_v0 = vpop.eup %2461 }
0x19db   :  { %v1063_v7 = vmul.f32 %v2462_v0, %v1061_v4 }
0x1a3e   :  { %v1066_v2 = vpop.permute.xlu0 %1065 }
0x1a3f   :  { %v1068_v3 = vmul.f32 %v2462_v0, %v1066_v2 }
0x1a41   :  { %1070 = vrot.lane.b32.xlu1 %v1068_v3, %s2573_s4 }
0x1ab3   :  { %v1071_v8 = vpop.permute.xlu1 %1070 }
0x1ab4   :  { %v1073_v9 = vadd.f32 %v1071_v8, %v1063_v7 }
0x1ab6   :  { %2463 = vtanh.f32 %v1073_v9  ;;  %v1203_v35 = vrot.slane %v1073_v9, 6 }
0x1ac0   :  { %v2464_v10 = vpop.eup %2463 }
0x1ac1   :  { %1076 = vrot.lane.b32.xlu0 %v2464_v10, %s2572_s26 }
0x1b33   :  { %v1077_v12 = vpop.permute.xlu0 %1076 }
0x1b34   :  { %v1079_v14 = vmul.f32 %v2462_v0, %v1077_v12 }
0x1b36   :  { %v1080_v15 = vpack.c.bf16 %v1079_v14, %v1079_v14 }
0x1b38   :  { %v1082_v16 = vrot.slane %v1080_v15, 1 }
0x1b3a   :  { %1083 = vrot.lane.b32.xlu1 %v1082_v16, %s2573_s4 }
0x1bac   :  { %v1084_v17 = vpop.permute.xlu1 %1083 }
0x1bad   :  { %2266 = vmatmul.mubr.msk.bf16.vlgmr.msra.gmra.mrb[24].mxu1 %vm70_vm1, %v1084_v17  ;;  %2274 = vmatmul.mubr.msk.bf16.vlgmr.msra.gmra.mrb[28].mxu0 %vm70_vm1, %v1084_v17 }
0x1bae   :  { %2278 = vmatpush3.bf16.msra.mxu1 %v2822_v44  ;;  %2286 = vmatpush3.bf16.msra.mxu0 %v2792_v11 }
0x1baf   :  { %2279 = vmatprep.subr.bf16.mxu1 %v2569_v1  ;;  %2287 = vmatprep.subr.bf16.mxu0 %v2569_v1 }
0x1bb0   :  { %2281 = vmatprep.mubr.msk.bf16.mxu1 %vm2570_vm0, %v2569_v1  ;;  %2289 = vmatprep.mubr.msk.bf16.mxu0 %vm2570_vm0, %v2569_v1 }
0x1bb2   :  { %2280 = vmatpush3.bf16.msra.mxu1 %v2828_v45  ;;  %2288 = vmatpush3.bf16.msra.mxu0 %v2798_v21 }
0x1bb3   :  { %2293 = vmatprep.subr.bf16.mxu1 %v2569_v1  ;;  %2301 = vmatprep.subr.bf16.mxu0 %v2569_v1 }
0x1c80   :  { %v2870_v18 = vpop.f32.mrb[24].mxu1  ;;  %v1185_v19 = vpop.f32.mrb[28].mxu0 }
0x1c81   :  { %v1192_v20 = vrot.slane %v1185_v19, 4  ;;  %v2267_v22 = vpop.f32.mrb[25].mxu1  ;;  %v2275_v23 = vpop.f32.mrb[29].mxu0 }
0x1c82   :  { %v1125_v5 = vpop.f32.mrb[26].mxu1  ;;  %v1188_v24 = vpop.f32.mrb[30].mxu0 }
0x1c83   :  { %v1194_v25 = vadd.f32 %v1192_v20, %v2814_v6  ;;  %v2268_v26 = vpop.f32.mrb[27].mxu1  ;;  %v2276_v27 = vpop.f32.mrb[31].mxu0 }
0x1c85   :  { %2465 = vtanh.f32 %v1194_v25  ;;  %v2062_v29 = vmul.f32 -1.442695, %v1194_v25 }
0x1c87   :  { %2467 = vpow2.f32 %v2062_v29 }
0x1c8f   :  { %v2466_v28 = vpop.eup %2465 }
0x1c90   :  { %1207 = vrot.lane.b32.xlu0 %v2466_v28, %s2572_s26 }
0x1c91   :  { %v2468_v30 = vpop.eup %2467 }
0x1c92   :  { %v1198_v31 = vadd.f32 1.0, %v2468_v30 }
0x1c94   :  { %2469 = vrcp.f32 %v1198_v31 }
0x1c9e   :  { %v2470_v32 = vpop.eup %2469 }
0x1c9f   :  { %v1205_v38 = vmul.f32 %v2470_v32, %v1203_v35 }
0x1d02   :  { %v1208_v33 = vpop.permute.xlu0 %1207 }
0x1d03   :  { %v1210_v34 = vmul.f32 %v2470_v32, %v1208_v33 }
0x1d05   :  { %1212 = vrot.lane.b32.xlu1 %v1210_v34, %s2573_s4 }
0x1d77   :  { %v1213_v39 = vpop.permute.xlu1 %1212 }
0x1d78   :  { %v1215_v41 = vadd.f32 %v1213_v39, %v1205_v38 }
0x1d7a   :  { %2471 = vtanh.f32 %v1215_v41  ;;  %v1345_v2 = vrot.slane %v1215_v41, 6 }
0x1d84   :  { %v2472_v36 = vpop.eup %2471 }
0x1d85   :  { %1218 = vrot.lane.b32.xlu0 %v2472_v36, %s2572_s26 }
0x1df7   :  { %v1219_v37 = vpop.permute.xlu0 %1218 }
0x1df8   :  { %v1221_v42 = vmul.f32 %v2470_v32, %v1219_v37 }
0x1dfa   :  { %v1222_v43 = vpack.c.bf16 %v1221_v42, %v1221_v42 }
0x1dfc   :  { %v1224_v46 = vrot.slane %v1222_v43, 2 }
0x1dfe   :  { %1225 = vrot.lane.b32.xlu1 %v1224_v46, %s2573_s4 }
0x1e70   :  { %v1226_v47 = vpop.permute.xlu1 %1225 }
0x1e71   :  { %2282 = vmatmul.mubr.msk.bf16.vlgmr.msra.gmra.mrb[28].mxu1 %vm70_vm1, %v1226_v47  ;;  %2290 = vmatmul.mubr.msk.bf16.vlgmr.msra.gmra.mrb[32].mxu0 %vm70_vm1, %v1226_v47 }
0x1e72   :  { %2294 = vmatpush3.bf16.msra.mxu1 %v2822_v44  ;;  %2302 = vmatpush3.bf16.msra.mxu0 %v2792_v11 }
0x1e73   :  { %2295 = vmatprep.subr.bf16.mxu1 %v2569_v1  ;;  %2303 = vmatprep.subr.bf16.mxu0 %v2569_v1 }
0x1e74   :  { %2297 = vmatprep.mubr.msk.bf16.mxu1 %vm2570_vm0, %v2569_v1  ;;  %2305 = vmatprep.mubr.msk.bf16.mxu0 %vm2570_vm0, %v2569_v1 }
0x1e76   :  { %2296 = vmatpush3.bf16.msra.mxu1 %v2828_v45  ;;  %2304 = vmatpush3.bf16.msra.mxu0 %v2798_v21 }
0x1e77   :  { %2309 = vmatprep.subr.bf16.mxu1 %v2569_v1  ;;  %2317 = vmatprep.subr.bf16.mxu0 %v2569_v1 }
0x1f44   :  { %v2891_v48 = vpop.f32.mrb[28].mxu1  ;;  %v1327_v49 = vpop.f32.mrb[32].mxu0 }
0x1f45   :  { %v1334_v13 = vrot.slane %v1327_v49, 2  ;;  %v2283_v51 = vpop.f32.mrb[29].mxu1  ;;  %v2291_v52 = vpop.f32.mrb[33].mxu0 }
0x1f46   :  { %v1267_v53 = vpop.f32.mrb[30].mxu1  ;;  %v1330_v54 = vpop.f32.mrb[34].mxu0 }
0x1f47   :  { %v1336_v55 = vadd.f32 %v1334_v13, %v2814_v6  ;;  %v2284_v56 = vpop.f32.mrb[31].mxu1  ;;  %v2292_v57 = vpop.f32.mrb[35].mxu0 }
0x1f49   :  { %2473 = vtanh.f32 %v1336_v55  ;;  %v2065_v59 = vmul.f32 -1.442695, %v1336_v55 }
0x1f4b   :  { %2475 = vpow2.f32 %v2065_v59 }
0x1f53   :  { %v2474_v58 = vpop.eup %2473 }
0x1f54   :  { %1349 = vrot.lane.b32.xlu0 %v2474_v58, %s2572_s26 }
0x1f55   :  { %v2476_v60 = vpop.eup %2475 }
0x1f56   :  { %v1340_v61 = vadd.f32 1.0, %v2476_v60 }
0x1f58   :  { %2477 = vrcp.f32 %v1340_v61 }
0x1f62   :  { %v2478_v62 = vpop.eup %2477 }
0x1f63   :  { %v1347_v3 = vmul.f32 %v2478_v62, %v1345_v2 }
0x1fc6   :  { %v1350_v63 = vpop.permute.xlu0 %1349 }
0x1fc7   :  { %v1352_v0 = vmul.f32 %v2478_v62, %v1350_v63 }
0x1fc9   :  { %1354 = vrot.lane.b32.xlu1 %v1352_v0, %s2573_s4 }
0x203b   :  { %v1355_v4 = vpop.permute.xlu1 %1354 }
0x203c   :  { %v1357_v6 = vadd.f32 %v1355_v4, %v1347_v3 }
0x203e   :  { %2479 = vtanh.f32 %v1357_v6  ;;  %v1484_v32 = vrot.slane %v1357_v6, 6 }
0x2048   :  { %v2480_v7 = vpop.eup %2479 }
0x2049   :  { %1360 = vrot.lane.b32.xlu0 %v2480_v7, %s2572_s26 }
0x20bb   :  { %v1361_v8 = vpop.permute.xlu0 %1360 }
0x20bc   :  { %v1363_v9 = vmul.f32 %v2478_v62, %v1361_v8 }
0x20be   :  { %v1364_v10 = vpack.c.bf16 %v1363_v9, %v1363_v9 }
0x20c0   :  { %v1366_v12 = vrot.slane %v1364_v10, 3 }
0x20c2   :  { %1367 = vrot.lane.b32.xlu1 %v1366_v12, %s2573_s4 }
0x2134   :  { %v1368_v14 = vpop.permute.xlu1 %1367 }
0x2135   :  { %2298 = vmatmul.mubr.msk.bf16.vlgmr.msra.gmra.mrb[32].mxu1 %vm70_vm1, %v1368_v14  ;;  %2306 = vmatmul.mubr.msk.bf16.vlgmr.msra.gmra.mrb[36].mxu0 %vm70_vm1, %v1368_v14 }
0x2136   :  { %2310 = vmatpush3.bf16.msra.mxu1 %v2822_v44  ;;  %2318 = vmatpush3.bf16.msra.mxu0 %v2792_v11 }
0x2137   :  { %2311 = vmatprep.subr.bf16.mxu1 %v2569_v1  ;;  %2319 = vmatprep.subr.bf16.mxu0 %v2569_v1 }
0x2138   :  { %2313 = vmatprep.mubr.msk.bf16.mxu1 %vm2570_vm0, %v2569_v1  ;;  %2321 = vmatprep.mubr.msk.bf16.mxu0 %vm2570_vm0, %v2569_v1 }
0x213a   :  { %2312 = vmatpush3.bf16.msra.mxu1 %v2828_v45  ;;  %2320 = vmatpush3.bf16.msra.mxu0 %v2798_v21 }
0x213b   :  { %2325 = vmatprep.subr.bf16.mxu1 %v2569_v1  ;;  %2333 = vmatprep.subr.bf16.mxu0 %v2569_v1 }
0x2208   :  { %v2912_v15 = vpop.f32.mrb[32].mxu1  ;;  %v1469_v16 = vpop.f32.mrb[36].mxu0 }
0x2209   :  { %v1475_v17 = vadd.f32 %v1469_v16, %v2713_v40  ;;  %v2299_v19 = vpop.f32.mrb[33].mxu1  ;;  %v2307_v20 = vpop.f32.mrb[37].mxu0 }
0x220a   :  { %v1409_v22 = vpop.f32.mrb[34].mxu1  ;;  %v1472_v23 = vpop.f32.mrb[38].mxu0 }
0x220b   :  { %2481 = vtanh.f32 %v1475_v17  ;;  %v2300_v5 = vpop.f32.mrb[35].mxu1  ;;  %v2308_v24 = vpop.f32.mrb[39].mxu0  ;;  %v2068_v26 = vmul.f32 -1.442695, %v1475_v17 }
0x220d   :  { %2483 = vpow2.f32 %v2068_v26 }
0x2215   :  { %v2482_v25 = vpop.eup %2481 }
0x2216   :  { %1488 = vrot.lane.b32.xlu0 %v2482_v25, %s2572_s26 }
0x2217   :  { %v2484_v27 = vpop.eup %2483 }
0x2218   :  { %v1479_v28 = vadd.f32 1.0, %v2484_v27 }
0x221a   :  { %2485 = vrcp.f32 %v1479_v28 }
0x2224   :  { %v2486_v29 = vpop.eup %2485 }
0x2225   :  { %v1486_v33 = vmul.f32 %v2486_v29, %v1484_v32 }
0x2288   :  { %v1489_v30 = vpop.permute.xlu0 %1488 }
0x2289   :  { %v1491_v31 = vmul.f32 %v2486_v29, %v1489_v30 }
0x228b   :  { %1493 = vrot.lane.b32.xlu1 %v1491_v31, %s2573_s4 }
0x22fd   :  { %v1494_v34 = vpop.permute.xlu1 %1493 }
0x22fe   :  { %v1496_v35 = vadd.f32 %v1494_v34, %v1486_v33 }
0x2300   :  { %2487 = vtanh.f32 %v1496_v35  ;;  %v1625_v62 = vrot.slane %v1496_v35, 6 }
0x230a   :  { %v2488_v38 = vpop.eup %2487 }
0x230b   :  { %1499 = vrot.lane.b32.xlu0 %v2488_v38, %s2572_s26 }
0x237d   :  { %v1500_v39 = vpop.permute.xlu0 %1499 }
0x237e   :  { %v1502_v41 = vmul.f32 %v2486_v29, %v1500_v39 }
0x2380   :  { %v1503_v36 = vpack.c.bf16 %v1502_v41, %v1502_v41 }
0x2382   :  { %1505 = vrot.lane.b32.xlu1 %v1503_v36, %s2573_s4 }
0x23f4   :  { %v1506_v37 = vpop.permute.xlu1 %1505 }
0x23f5   :  { %2314 = vmatmul.mubr.msk.bf16.vlgmr.msra.gmra.mrb[36].mxu1 %vm70_vm1, %v1506_v37  ;;  %2322 = vmatmul.mubr.msk.bf16.vlgmr.msra.gmra.mrb[40].mxu0 %vm70_vm1, %v1506_v37 }
0x23f6   :  { %2326 = vmatpush3.bf16.msra.mxu1 %v2822_v44  ;;  %2334 = vmatpush3.bf16.msra.mxu0 %v2792_v11 }
0x23f7   :  { %2327 = vmatprep.subr.bf16.mxu1 %v2569_v1  ;;  %2335 = vmatprep.subr.bf16.mxu0 %v2569_v1 }
0x23f8   :  { %2329 = vmatprep.mubr.msk.bf16.mxu1 %vm2570_vm0, %v2569_v1  ;;  %2337 = vmatprep.mubr.msk.bf16.mxu0 %vm2570_vm0, %v2569_v1 }
0x23fa   :  { %2328 = vmatpush3.bf16.msra.mxu1 %v2828_v45  ;;  %2336 = vmatpush3.bf16.msra.mxu0 %v2798_v21 }
0x23fb   :  { %2341 = vmatprep.subr.bf16.mxu1 %v2569_v1  ;;  %2349 = vmatprep.subr.bf16.mxu0 %v2569_v1 }
0x24c8   :  { %v2933_v42 = vpop.f32.mrb[36].mxu1  ;;  %v1607_v43 = vpop.f32.mrb[40].mxu0 }
0x24c9   :  { %v1614_v46 = vrot.slane %v1607_v43, 6  ;;  %v2315_v47 = vpop.f32.mrb[37].mxu1  ;;  %v2323_v49 = vpop.f32.mrb[41].mxu0 }
0x24ca   :  { %v1547_v13 = vpop.f32.mrb[38].mxu1  ;;  %v1610_v51 = vpop.f32.mrb[42].mxu0 }
0x24cb   :  { %v1616_v52 = vadd.f32 %v1614_v46, %v2713_v40  ;;  %v2316_v53 = vpop.f32.mrb[39].mxu1  ;;  %v2324_v54 = vpop.f32.mrb[43].mxu0 }
0x24cd   :  { %2489 = vtanh.f32 %v1616_v52  ;;  %v2071_v56 = vmul.f32 -1.442695, %v1616_v52 }
0x24cf   :  { %2491 = vpow2.f32 %v2071_v56 }
0x24d7   :  { %v2490_v55 = vpop.eup %2489 }
0x24d8   :  { %1629 = vrot.lane.b32.xlu0 %v2490_v55, %s2572_s26 }
0x24d9   :  { %v2492_v57 = vpop.eup %2491 }
0x24da   :  { %v1620_v58 = vadd.f32 1.0, %v2492_v57 }
0x24dc   :  { %2493 = vrcp.f32 %v1620_v58 }
0x24e6   :  { %v2494_v59 = vpop.eup %2493 }
0x24e7   :  { %v1627_v63 = vmul.f32 %v2494_v59, %v1625_v62 }
0x254a   :  { %v1630_v60 = vpop.permute.xlu0 %1629 }
0x254b   :  { %v1632_v61 = vmul.f32 %v2494_v59, %v1630_v60 }
0x254d   :  { %1634 = vrot.lane.b32.xlu1 %v1632_v61, %s2573_s4 }
0x25bf   :  { %v1635_v0 = vpop.permute.xlu1 %1634 }
0x25c0   :  { %v1637_v2 = vadd.f32 %v1635_v0, %v1627_v63 }
0x25c2   :  { %2495 = vtanh.f32 %v1637_v2  ;;  %v1767_v29 = vrot.slane %v1637_v2, 6 }
0x25cc   :  { %v2496_v3 = vpop.eup %2495 }
0x25cd   :  { %1640 = vrot.lane.b32.xlu0 %v2496_v3, %s2572_s26 }
0x263f   :  { %v1641_v4 = vpop.permute.xlu0 %1640 }
0x2640   :  { %v1643_v6 = vmul.f32 %v2494_v59, %v1641_v4 }
0x2642   :  { %v1644_v7 = vpack.c.bf16 %v1643_v6, %v1643_v6 }
0x2644   :  { %v1646_v8 = vrot.slane %v1644_v7, 1 }
0x2646   :  { %1647 = vrot.lane.b32.xlu1 %v1646_v8, %s2573_s4 }
0x26b8   :  { %v1648_v9 = vpop.permute.xlu1 %1647 }
0x26b9   :  { %2330 = vmatmul.mubr.msk.bf16.vlgmr.msra.gmra.mrb[40].mxu1 %vm70_vm1, %v1648_v9  ;;  %2338 = vmatmul.mubr.msk.bf16.vlgmr.msra.gmra.mrb[44].mxu0 %vm70_vm1, %v1648_v9  ;;  %v830_v9 = vlaneseq }
0x26ba   :  { %2342 = vmatpush3.bf16.msra.mxu1 %v2822_v44  ;;  %2350 = vmatpush3.bf16.msra.mxu0 %v2792_v11 }
0x26bb   :  { %2343 = vmatprep.subr.bf16.mxu1 %v2569_v1  ;;  %2351 = vmatprep.subr.bf16.mxu0 %v2569_v1 }
0x26bc   :  { %2345 = vmatprep.mubr.msk.bf16.mxu1 %vm2570_vm0, %v2569_v1  ;;  %2353 = vmatprep.mubr.msk.bf16.mxu0 %vm2570_vm0, %v2569_v1 }
0x26be   :  { %2344 = vmatpush3.bf16.msra.mxu1 %v2828_v45  ;;  %2352 = vmatpush3.bf16.msra.mxu0 %v2798_v21 }
0x26bf   :  { %2357 = vmatprep.subr.bf16.mxu1 %v2569_v1 }
0x278c   :  { %v2953_v10 = vpop.f32.mrb[40].mxu1  ;;  %v1749_v12 = vpop.f32.mrb[44].mxu0 }
0x278d   :  { %v1756_v11 = vrot.slane %v1749_v12, 4  ;;  %v2331_v14 = vpop.f32.mrb[41].mxu1  ;;  %v2339_v16 = vpop.f32.mrb[45].mxu0 }
0x278e   :  { %v1689_v17 = vpop.f32.mrb[42].mxu1  ;;  %v1752_v19 = vpop.f32.mrb[46].mxu0 }
0x278f   :  { %v1758_v20 = vadd.f32 %v1756_v11, %v2713_v40  ;;  %v2332_v22 = vpop.f32.mrb[43].mxu1  ;;  %v2340_v23 = vpop.f32.mrb[47].mxu0  ;;  %v2985_v11 = vand.u32 127, %v830_v9 }
0x2791   :  { %2497 = vtanh.f32 %v1758_v20  ;;  %v2074_v24 = vmul.f32 -1.442695, %v1758_v20 }
0x2793   :  { %2499 = vpow2.f32 %v2074_v24  ;;  %v1140_v24 = vld [vmem:[%s3122_s10 + $0x2] sm:$0x3] }
0x279b   :  { %v2498_v5 = vpop.eup %2497 }
0x279c   :  { %1771 = vrot.lane.b32.xlu0 %v2498_v5, %s2572_s26 }
0x279d   :  { %v2500_v21 = vpop.eup %2499 }
0x279e   :  { %v1762_v25 = vadd.f32 1.0, %v2500_v21 }
0x27a0   :  { %2501 = vrcp.f32 %v1762_v25 }
0x27aa   :  { %v2502_v26 = vpop.eup %2501 }
0x27ab   :  { %v1769_v30 = vmul.f32 %v2502_v26, %v1767_v29 }
0x280e   :  { %v1772_v27 = vpop.permute.xlu0 %1771 }
0x280f   :  { %v1774_v28 = vmul.f32 %v2502_v26, %v1772_v27 }
0x2811   :  { %1776 = vrot.lane.b32.xlu1 %v1774_v28, %s2573_s4 }
0x2883   :  { %v1777_v31 = vpop.permute.xlu1 %1776 }
0x2884   :  { %v1779_v32 = vadd.f32 %v1777_v31, %v1769_v30 }
0x2886   :  { %2503 = vtanh.f32 %v1779_v32  ;;  %v1909_v60 = vrot.slane %v1779_v32, 6 }
0x2890   :  { %v2504_v33 = vpop.eup %2503 }
0x2891   :  { %1782 = vrot.lane.b32.xlu0 %v2504_v33, %s2572_s26 }
0x2903   :  { %v1783_v34 = vpop.permute.xlu0 %1782 }
0x2904   :  { %v1785_v35 = vmul.f32 %v2502_v26, %v1783_v34 }
0x2906   :  { %v1786_v38 = vpack.c.bf16 %v1785_v35, %v1785_v35 }
0x2908   :  { %v1788_v39 = vrot.slane %v1786_v38, 2 }
0x290a   :  { %1789 = vrot.lane.b32.xlu1 %v1788_v39, %s2573_s4 }
0x297c   :  { %v1790_v41 = vpop.permute.xlu1 %1789 }
0x297d   :  { %2346 = vmatmul.mubr.msk.bf16.vlgmr.msra.gmra.mrb[44].mxu1 %vm70_vm1, %v1790_v41  ;;  %2354 = vmatmul.mubr.msk.bf16.vlgmr.msra.gmra.mrb[48].mxu0 %vm70_vm1, %v1790_v41 }
0x297e   :  { %2358 = vmatpush3.bf16.msra.mxu1 %v2822_v44  ;;  %2361 = vmatprep.mubr.msk.bf16.mxu1 %vm2570_vm0, %v2569_v1 }
0x297f   :  { %2359 = vmatprep.subr.bf16.mxu1 %v2569_v1 }
0x2982   :  { %2360 = vmatpush3.bf16.msra.mxu1 %v2828_v45 }
0x2a50   :  { %v2967_v36 = vpop.f32.mrb[44].mxu1  ;;  %v1891_v37 = vpop.f32.mrb[48].mxu0 }
0x2a51   :  { %v1898_v43 = vrot.slane %v1891_v37, 2  ;;  %v2347_v46 = vpop.f32.mrb[45].mxu1  ;;  %v2355_v47 = vpop.f32.mrb[49].mxu0 }
0x2a52   :  { %v1831_v49 = vpop.f32.mrb[46].mxu1  ;;  %v1894_v13 = vpop.f32.mrb[50].mxu0 }
0x2a53   :  { %v1900_v51 = vadd.f32 %v1898_v43, %v2713_v40  ;;  %v2348_v52 = vpop.f32.mrb[47].mxu1  ;;  %v2356_v53 = vpop.f32.mrb[51].mxu0  ;;  %v2975_v40 = vld [vmem:[%s3121_s9] ss:$0 sm:$0xff] }
0x2a54   :  { %v980_v58 = vadd.f32 %v2975_v40, %v2849_v50  ;;  %v998_v50 = vld [vmem:[%s3122_s10] sm:$0x3]  ;;  %v1123_v23 = vadd.f32 %v2975_v40, %v2870_v18  ;;  %v2998_v21 = vadd.f32 %v2975_v40, %v2891_v48  ;;  %v3002_v25 = vadd.f32 %v2975_v40, %v2912_v15 }
0x2a55   :  { %2505 = vtanh.f32 %v1900_v51  ;;  %v2077_v54 = vmul.f32 -1.442695, %v1900_v51 }
0x2a56   :  { %v986_v59 = vsel %vm985_vm2, %v980_v58, -inf  ;;  %v1128_v5 = vsel %vm985_vm2, %v1123_v23, -inf  ;;  %v1270_v26 = vsel %vm985_vm2, %v2998_v21, -inf  ;;  %v1412_v18 = vsel %vm985_vm2, %v3002_v25, -inf }
0x2a57   :  { %2507 = vpow2.f32 %v2077_v54  ;;  %v1424_v54 = vld [vmem:[%s3122_s10 + $0x6] sm:$0x3] }
0x2a5f   :  { %v2506_v44 = vpop.eup %2505 }
0x2a60   :  { %1913 = vrot.lane.b32.xlu0 %v2506_v44, %s2572_s26 }
0x2a61   :  { %v2508_v1 = vpop.eup %2507 }
0x2a62   :  { %v1904_v45 = vadd.f32 1.0, %v2508_v1  ;;  %v1282_v1 = vld [vmem:[%s3122_s10 + $0x4] sm:$0x3] }
0x2a64   :  { %2509 = vrcp.f32 %v1904_v45  ;;  %v3030_v45 = vadd.f32 %v2975_v40, %v2933_v42 }
0x2a6e   :  { %v2510_v55 = vpop.eup %2509 }
0x2a6f   :  { %v1911_v61 = vmul.f32 %v2510_v55, %v1909_v60 }
0x2ad2   :  { %v1914_v56 = vpop.permute.xlu0 %1913 }
0x2ad3   :  { %v1916_v57 = vmul.f32 %v2510_v55, %v1914_v56  ;;  %v1550_v56 = vsel %vm985_vm2, %v3030_v45, -inf }
0x2ad5   :  { %1918 = vrot.lane.b32.xlu1 %v1916_v57, %s2573_s4 }
0x2af9   :  { %987 = vmax.xlane.f32.xlu1 %v986_v59 }
0x2b47   :  { %v1919_v62 = vpop.permute.xlu1 %1918 }
0x2b48   :  { %v1921_v63 = vadd.f32 %v1919_v62, %v1911_v61 }
0x2b4a   :  { %2511 = vtanh.f32 %v1921_v63 }
0x2b54   :  { %v2512_v0 = vpop.eup %2511 }
0x2b55   :  { %1924 = vrot.lane.b32.xlu0 %v2512_v0, %s2572_s26 }
0x2b86   :  { %v988_v2 = vpop.xlane.xlu1 %987 }
0x2b87   :  { %v989_v3 = vsub.f32 %v980_v58, %v988_v2 }
0x2b89   :  { %v990_v4 = vmul.f32 1.442695, %v989_v3 }
0x2b8b   :  { %2513 = vpow2.f32 %v990_v4 }
0x2b95   :  { %v2514_v6 = vpop.eup %2513 }
0x2b96   :  { %v992_v7 = vsel %vm985_vm2, %v2514_v6, 0.0 }
0x2b97   :  { %993 = vadd.xlane.f32.xlu0 %v992_v7 }
0x2bad   :  { %1000 = vperm.xlu0 %2371, %v998_v50  }
0x2bc7   :  { %v1925_v8 = vpop.permute.xlu0 %1924 }
0x2bc8   :  { %v1927_v19 = vmul.f32 %v2510_v55, %v1925_v8  ;;  %v3034_v55 = vadd.f32 %v2975_v40, %v2953_v10 }
0x2bca   :  { %v1928_v20 = vpack.c.bf16 %v1927_v19, %v1927_v19  ;;  %v1692_v57 = vsel %vm985_vm2, %v3034_v55, -inf }
0x2bcc   :  { %v1930_v22 = vrot.slane %v1928_v20, 3 }
0x2c24   :  { %v994_v12 = vpop.xlane.xlu0 %993 }
0x2c25   :  { %2515 = vlog2.f32 %v994_v12 }
0x2c2c   :  { %v1001_v14 = vpop.permute.xlu0 %1000 }
0x2c2d   :  { %vm1002_vm3 = vcmp.eq.s32.totalorder %v2985_v11, %v1001_v14 }
0x2c2e   :  { %v1003_v16 = vsel %vm1002_vm3, %v980_v58, 0.0 }
0x2c2f   :  { %v1004_v17 = vsel %vm985_vm2, %v1003_v16, 0.0  ;;  %v2516_v27 = vpop.eup %2515 }
0x2c30   :  { %1005 = vadd.xlane.f32.xlu1 %v1004_v17  ;;  %v996_v28 = vmul.f32 0.6931472, %v2516_v27  ;;  %v3064_v27 = vadd.f32 %v2975_v40, %v2967_v36 }
0x2c32   :  { %v997_v29 = vadd.f32 %v996_v28, %v988_v2 }
0x2c41   :  { %1931 = vrot.lane.b32.xlu1 %v1930_v22, %s2573_s4 }
0x2c65   :  { %1129 = vmax.xlane.f32.xlu1 %v1128_v5 }
0x2c76   :  { %1142 = vperm.xlu1 %2372, %v1140_v24  }
0x2c9a   :  { %1271 = vmax.xlane.f32.xlu1 %v1270_v26  ;;  %v1704_v26 = vld [vmem:[%s3122_s10 + $0xa] sm:$0x3] }
0x2c9e   :  { %1413 = vmax.xlane.f32.xlu1 %v1412_v18  ;;  %v1562_v18 = vld [vmem:[%s3122_s10 + $0x8] sm:$0x3] }
0x2cbd   :  { %v1006_v30 = vpop.xlane.xlu1 %1005 }
0x2cbe   :  { %v1007_v31 = vsub.f32 %v997_v29, %v1006_v30  ;;  %v1834_v29 = vsel %vm985_vm2, %v3064_v27, -inf }
0x2cc1   :  { %v1932_v48 = vpop.permute.xlu1 %1931 }
0x2cc2   :  { %2362 = vmatmul.mubr.msk.bf16.vlgmr.msra.gmra.mrb[48].mxu1 %vm70_vm1, %v1932_v48 }
0x2cf2   :  { %v1130_v32 = vpop.xlane.xlu1 %1129 }
0x2cf3   :  { %v1131_v15 = vsub.f32 %v1123_v23, %v1130_v32 }
0x2cf5   :  { %v1132_v33 = vmul.f32 1.442695, %v1131_v15 }
0x2cf6   :  { %v1143_v34 = vpop.permute.xlu1 %1142 }
0x2cf7   :  { %2517 = vpow2.f32 %v1132_v33  ;;  %vm1144_vm4 = vcmp.eq.s32.totalorder %v2985_v11, %v1143_v34 }
0x2cf8   :  { %v1145_v39 = vsel %vm1144_vm4, %v1123_v23, 0.0 }
0x2cf9   :  { %v1146_v41 = vsel %vm985_vm2, %v1145_v39, 0.0 }
0x2d01   :  { %v2518_v35 = vpop.eup %2517 }
0x2d02   :  { %v1134_v38 = vsel %vm985_vm2, %v2518_v35, 0.0 }
0x2d03   :  { %1135 = vadd.xlane.f32.xlu0 %v1134_v38 }
0x2d07   :  { %1147 = vadd.xlane.f32.xlu0 %v1146_v41 }
0x2d27   :  { %v3012_v37 = vpop.xlane.xlu1 %1271 }
0x2d28   :  { %v1273_v43 = vsub.f32 %v2998_v21, %v3012_v37 }
0x2d2a   :  { %v1274_v46 = vmul.f32 1.442695, %v1273_v43 }
0x2d2b   :  { %v3016_v47 = vpop.xlane.xlu1 %1413 }
0x2d2c   :  { %2519 = vpow2.f32 %v1274_v46  ;;  %v1415_v49 = vsub.f32 %v3002_v25, %v3016_v47 }
0x2d2e   :  { %v1416_v13 = vmul.f32 1.442695, %v1415_v49 }
0x2d30   :  { %2521 = vpow2.f32 %v1416_v13 }
0x2d36   :  { %v2520_v51 = vpop.eup %2519 }
0x2d37   :  { %v1276_v52 = vsel %vm985_vm2, %v2520_v51, 0.0 }
0x2d38   :  { %1277 = vadd.xlane.f32.xlu0 %v1276_v52 }
0x2d3a   :  { %v2522_v53 = vpop.eup %2521 }
0x2d3b   :  { %v1418_v44 = vsel %vm985_vm2, %v2522_v53, 0.0 }
0x2d3c   :  { %1419 = vadd.xlane.f32.xlu1 %v1418_v44 }
0x2d4d   :  { %1426 = vperm.xlu1 %2372, %v1424_v54  }
0x2d4e   :  { %1284 = vperm.xlu0 %2371, %v1282_v1  }
0x2d71   :  { %1551 = vmax.xlane.f32.xlu1 %v1550_v56 }
0x2d75   :  { %1693 = vmax.xlane.f32.xlu1 %v1692_v57 }
0x2d90   :  { %v1136_v58 = vpop.xlane.xlu0 %1135 }
0x2d91   :  { %2523 = vlog2.f32 %v1136_v58 }
0x2d94   :  { %v1148_v2 = vpop.xlane.xlu0 %1147 }
0x2d95   :  { %v1970_v59 = vpop.f32.mrb[48].mxu1 }
0x2d96   :  { %v2363_v60 = vpop.f32.mrb[49].mxu1  ;;  %v3067_v28 = vadd.f32 %v2975_v40, %v1970_v59 }
0x2d97   :  { %v1973_v61 = vpop.f32.mrb[50].mxu1  ;;  %v1988_v60 = vld [vmem:[%s3122_s10 + $0xe] sm:$0x3] }
0x2d98   :  { %v2364_v62 = vpop.f32.mrb[51].mxu1  ;;  %v1976_v30 = vsel %vm985_vm2, %v3067_v28, -inf  ;;  %v1846_v61 = vld [vmem:[%s3122_s10 + $0xc] sm:$0x3]  ;;  %s2574_s10 = smov [#allocation2]  }
0x2d99   :  { %s2015_s13 = sshll.u32 %s2574_s10, 4  ;;  %s2016_s13 = int_to_ptr.vmem [resolvable:$true] %s2015_s13 }
0x2d9a   :  { %s2545_s1 = scalar_lea.vmem %s2016_s13, 16  ;;  %s2549_s5 = scalar_lea.vmem %s2016_s13, 32 }
0x2d9b   :  { %v2524_v42 = vpop.eup %2523  ;;  %p2546_p0 = scmp.ne.s32.totalorder %s2016_s13, %s2545_s1  ;;  %p2550_p1 = scmp.lt.s32.totalorder %s2016_s13, %s2016_s13 }
0x2d9c   :  { %v1138_v63 = vmul.f32 0.6931472, %v2524_v42  ;;  %p2551_p2 = scmp.lt.s32.totalorder %s2549_s5, %s2545_s1 }
0x2d9e   :  { %v1139_v0 = vadd.f32 %v1138_v63, %v1130_v32  ;;  %p2552_p3 = por %p2551_p2, %p2550_p1 }
0x2da0   :  { %v1149_v10 = vsub.f32 %v1139_v0, %v1148_v2  ;;  %p2553_p4 = pnand %p2552_p3, %p2546_p0 }
0x2da2   :  { %v1150_v3 = vadd.f32 %v1149_v10, %v1007_v31 }
0x2dc5   :  { %v1278_v4 = vpop.xlane.xlu0 %1277 }
0x2dc9   :  { %v1420_v6 = vpop.xlane.xlu1 %1419 }
0x2dcd   :  { %v1285_v7 = vpop.permute.xlu0 %1284  ;;  %v1427_v50 = vpop.permute.xlu1 %1426 }
0x2dce   :  { %vm1286_vm5 = vcmp.eq.s32.totalorder %v2985_v11, %v1285_v7  ;;  %vm1428_vm6 = vcmp.eq.s32.totalorder %v2985_v11, %v1427_v50 }
0x2dcf   :  { %v1287_v8 = vsel %vm1286_vm5, %v2998_v21, 0.0  ;;  %v1429_v12 = vsel %vm1428_vm6, %v3002_v25, 0.0 }
0x2dd0   :  { %v1288_v9 = vsel %vm985_vm2, %v1287_v8, 0.0  ;;  %v1430_v14 = vsel %vm985_vm2, %v1429_v12, 0.0 }
0x2dd1   :  { %1289 = vadd.xlane.f32.xlu0 %v1288_v9 }
0x2dd5   :  { %1431 = vadd.xlane.f32.xlu0 %v1430_v14 }
0x2dfe   :  { %v3046_v16 = vpop.xlane.xlu1 %1551 }
0x2dff   :  { %v1553_v17 = vsub.f32 %v3030_v45, %v3046_v16 }
0x2e01   :  { %v1554_v19 = vmul.f32 1.442695, %v1553_v17 }
0x2e02   :  { %v3050_v20 = vpop.xlane.xlu1 %1693 }
0x2e03   :  { %2525 = vpow2.f32 %v1554_v19  ;;  %v1695_v22 = vsub.f32 %v3034_v55, %v3050_v20 }
0x2e05   :  { %v1696_v23 = vmul.f32 1.442695, %v1695_v22 }
0x2e07   :  { %2527 = vpow2.f32 %v1696_v23 }
0x2e08   :  { %2529 = vlog2.f32 %v1278_v4 }
0x2e09   :  { %2531 = vlog2.f32 %v1420_v6 }
0x2e0d   :  { %v2526_v5 = vpop.eup %2525 }
0x2e0e   :  { %v1556_v24 = vsel %vm985_vm2, %v2526_v5, 0.0 }
0x2e0f   :  { %1557 = vadd.xlane.f32.xlu0 %v1556_v24 }
0x2e11   :  { %v2528_v21 = vpop.eup %2527 }
0x2e12   :  { %v1698_v25 = vsel %vm985_vm2, %v2528_v21, 0.0  ;;  %v2530_v31 = vpop.eup %2529 }
0x2e13   :  { %1699 = vadd.xlane.f32.xlu1 %v1698_v25  ;;  %v1280_v48 = vmul.f32 0.6931472, %v2530_v31  ;;  %v2532_v32 = vpop.eup %2531 }
0x2e14   :  { %v1422_v15 = vmul.f32 0.6931472, %v2532_v32 }
0x2e15   :  { %v1281_v36 = vadd.f32 %v1280_v48, %v3012_v37 }
0x2e16   :  { %v1423_v35 = vadd.f32 %v1422_v15, %v3016_v47 }
0x2e24   :  { %1706 = vperm.xlu1 %2372, %v1704_v26  }
0x2e25   :  { %1564 = vperm.xlu0 %2371, %v1562_v18  }
0x2e48   :  { %1835 = vmax.xlane.f32.xlu1 %v1834_v29 }
0x2e4c   :  { %1977 = vmax.xlane.f32.xlu1 %v1976_v30 }
0x2e5e   :  { %v1290_v33 = vpop.xlane.xlu0 %1289 }
0x2e5f   :  { %v1291_v34 = vsub.f32 %v1281_v36, %v1290_v33 }
0x2e61   :  { %v1292_v40 = vadd.f32 %v1291_v34, %v1150_v3 }
0x2e62   :  { %v1432_v38 = vpop.xlane.xlu0 %1431 }
0x2e63   :  { %v1433_v39 = vsub.f32 %v1423_v35, %v1432_v38 }
0x2e65   :  { %v1434_v41 = vadd.f32 %v1433_v39, %v1292_v40 }
0x2e9c   :  { %v1558_v43 = vpop.xlane.xlu0 %1557 }
0x2ea0   :  { %v1700_v46 = vpop.xlane.xlu1 %1699 }
0x2ea4   :  { %v1565_v49 = vpop.permute.xlu0 %1564  ;;  %v1707_v13 = vpop.permute.xlu1 %1706 }
0x2ea5   :  { %vm1566_vm7 = vcmp.eq.s32.totalorder %v2985_v11, %v1565_v49  ;;  %vm1708_vm8 = vcmp.eq.s32.totalorder %v2985_v11, %v1707_v13 }
0x2ea6   :  { %v1567_v51 = vsel %vm1566_vm7, %v3030_v45, 0.0  ;;  %v1709_v52 = vsel %vm1708_vm8, %v3034_v55, 0.0 }
0x2ea7   :  { %v1568_v37 = vsel %vm985_vm2, %v1567_v51, 0.0  ;;  %v1710_v47 = vsel %vm985_vm2, %v1709_v52, 0.0 }
0x2ea8   :  { %1569 = vadd.xlane.f32.xlu0 %v1568_v37 }
0x2eac   :  { %1711 = vadd.xlane.f32.xlu0 %v1710_v47 }
0x2ed5   :  { %v1836_v53 = vpop.xlane.xlu1 %1835 }
0x2ed6   :  { %v1837_v44 = vsub.f32 %v3064_v27, %v1836_v53 }
0x2ed8   :  { %v1838_v54 = vmul.f32 1.442695, %v1837_v44 }
0x2ed9   :  { %v1978_v1 = vpop.xlane.xlu1 %1977 }
0x2eda   :  { %2533 = vpow2.f32 %v1838_v54  ;;  %v1979_v56 = vsub.f32 %v3067_v28, %v1978_v1 }
0x2edc   :  { %v1980_v57 = vmul.f32 1.442695, %v1979_v56 }
0x2ede   :  { %2535 = vpow2.f32 %v1980_v57 }
0x2edf   :  { %2537 = vlog2.f32 %v1558_v43 }
0x2ee0   :  { %2539 = vlog2.f32 %v1700_v46 }
0x2ee4   :  { %v2534_v58 = vpop.eup %2533 }
0x2ee5   :  { %v1840_v45 = vsel %vm985_vm2, %v2534_v58, 0.0 }
0x2ee6   :  { %1841 = vadd.xlane.f32.xlu0 %v1840_v45 }
0x2ee8   :  { %v2536_v59 = vpop.eup %2535 }
0x2ee9   :  { %v1982_v55 = vsel %vm985_vm2, %v2536_v59, 0.0  ;;  %v2538_v62 = vpop.eup %2537 }
0x2eea   :  { %1983 = vadd.xlane.f32.xlu1 %v1982_v55  ;;  %v1560_v42 = vmul.f32 0.6931472, %v2538_v62  ;;  %v2540_v63 = vpop.eup %2539 }
0x2eeb   :  { %v1702_v0 = vmul.f32 0.6931472, %v2540_v63 }
0x2eec   :  { %v1561_v2 = vadd.f32 %v1560_v42, %v3046_v16 }
0x2eed   :  { %v1703_v6 = vadd.f32 %v1702_v0, %v3050_v20 }
0x2efb   :  { %1990 = vperm.xlu1 %2372, %v1988_v60  }
0x2efc   :  { %1848 = vperm.xlu0 %2371, %v1846_v61  }
0x2f35   :  { %v1570_v10 = vpop.xlane.xlu0 %1569 }
0x2f36   :  { %v1571_v3 = vsub.f32 %v1561_v2, %v1570_v10 }
0x2f38   :  { %v1572_v4 = vadd.f32 %v1571_v3, %v1434_v41 }
0x2f39   :  { %v1712_v7 = vpop.xlane.xlu0 %1711 }
0x2f3a   :  { %v1713_v50 = vsub.f32 %v1703_v6, %v1712_v7 }
0x2f3c   :  { %v1714_v8 = vadd.f32 %v1713_v50, %v1572_v4 }
0x2f73   :  { %v1842_v9 = vpop.xlane.xlu0 %1841 }
0x2f74   :  { %2541 = vlog2.f32 %v1842_v9 }
0x2f77   :  { %v1984_v12 = vpop.xlane.xlu1 %1983 }
0x2f78   :  { %2543 = vlog2.f32 %v1984_v12 }
0x2f7b   :  { %v1849_v14 = vpop.permute.xlu0 %1848  ;;  %v1991_v17 = vpop.permute.xlu1 %1990 }
0x2f7c   :  { %vm1850_vm9 = vcmp.eq.s32.totalorder %v2985_v11, %v1849_v14  ;;  %vm1992_vm10 = vcmp.eq.s32.totalorder %v2985_v11, %v1991_v17 }
0x2f7d   :  { %v1851_v19 = vsel %vm1850_vm9, %v3064_v27, 0.0  ;;  %v1993_v22 = vsel %vm1992_vm10, %v3067_v28, 0.0 }
0x2f7e   :  { %v1852_v16 = vsel %vm985_vm2, %v1851_v19, 0.0  ;;  %v1994_v20 = vsel %vm985_vm2, %v1993_v22, 0.0  ;;  %v2542_v23 = vpop.eup %2541 }
0x2f7f   :  { %1853 = vadd.xlane.f32.xlu0 %v1852_v16  ;;  %v1844_v5 = vmul.f32 0.6931472, %v2542_v23 }
0x2f81   :  { %v1845_v25 = vadd.f32 %v1844_v5, %v1836_v53 }
0x2f82   :  { %v2544_v24 = vpop.eup %2543 }
0x2f83   :  { %1995 = vadd.xlane.f32.xlu0 %v1994_v20  ;;  %v1986_v21 = vmul.f32 0.6931472, %v2544_v24 }
0x2f85   :  { %v1987_v29 = vadd.f32 %v1986_v21, %v1978_v1 }
0x300c   :  { %v1854_v26 = vpop.xlane.xlu0 %1853 }
0x300d   :  { %v1855_v18 = vsub.f32 %v1845_v25, %v1854_v26 }
0x300f   :  { %v1856_v11 = vadd.f32 %v1855_v18, %v1714_v8 }
0x3010   :  { %v1996_v27 = vpop.xlane.xlu0 %1995 }
0x3011   :  { %v1997_v30 = vsub.f32 %v1987_v29, %v1996_v27 }
0x3013   :  { %v1998_v31 = vadd.f32 %v1997_v30, %v1856_v11 }
0x3015   :  { %v1999_v48 = vsel %vm985_vm2, %v1998_v31, 0.0 }
0x3016   :  { %v2000_v28 = vrot.slane %v1999_v48, 4 }
0x3018   :  { %v2001_v32 = vadd.f32 %v2000_v28, %v1999_v48 }
0x301a   :  { %v2002_v15 = vrot.slane %v2001_v32, 2 }
0x301c   :  { %v2003_v36 = vadd.f32 %v2002_v15, %v2001_v32 }
0x301e   :  { %v2004_v33 = vrot.slane %v2003_v36, 1 }
0x3020   :  { %v2005_v34 = vadd.f32 %v2004_v33, %v2003_v36 }
0x3022   :  { %v2006_v40 = vmul.f32 0.0625, %v2005_v34 }
0x3024   :  { %2008 = vst.msk [vmem:[#allocation2] sm:$0x1] %vm2007_vm11, %v2006_v40 }
0x3025   :  { %2556 = shalt.err (!%p2553_p4)
}
0x3026   :  { %s2557_s15 = scalar_lea.hbm %s3123_s11, 16 }
0x3027   :  { %p2558_p5 = scmp.ne.s32.totalorder %s3123_s11, %s2557_s15  ;;  %p2561_p6 = scmp.lt.u32.totalorder %s2557_s15, %s3123_s11 }
0x3029   :  { %p2563_p7 = pnand %p2561_p6, %p2558_p5 }
0x302b   :  { %2566 = shalt.err (!%p2563_p7)
}
0x302c   :  { %2018 = dma.vmem_to_hbm [thread:$0]  %s2016_s13, 16, %s3123_s11, [#allocation3]  }
0x302d   :  { %2567 = dma.done.wait [#allocation3], 16  }
0x302e   :  { %2568 = vsyncadd [#allocation3], 4294967280 }
0x302f   :  { %2022 = vsyncpa [#allocation3], 1 }

</bundles_post_ra>
